<compile_context>
chip_gen: v7x
topology: tpu7x:2x2x1
jax: 0.10.0
libtpu: 0.0.40
codegen_flags: <defaults>
</compile_context>

<pallas_src>
import jax
import jax.numpy as jnp
import numpy as np
from jax.experimental import pallas as pl
from jax.experimental.pallas import tpu as pltpu

EPS = 1e-5
COMPUTE_DTYPE = jnp.bfloat16   # MXU operand dtype; accumulation is always f32.


# --------------------------------------------------------------------------------------
# In-kernel helpers
# --------------------------------------------------------------------------------------
def _partial_stats(h):
    """Per-image partial BN statistics of a (C, P) f32 slab -> (1, C, 2) [sum, sum_sq]."""
    s = jnp.sum(h, axis=1, keepdims=True)
    ss = jnp.sum(h * h, axis=1, keepdims=True)
    return jnp.concatenate([s, ss], axis=1).reshape(1, h.shape[0], 2)


def _bn_scale_shift(stats, gamma, beta, count):
    """Finalize BN from per-image partials (N, C, 2) -> per-channel scale/shift (C, 1)."""
    tot = jnp.sum(stats, axis=0)              # (C, 2)
    inv = 1.0 / count
    mu = tot[:, 0:1] * inv                    # (C, 1)
    var = tot[:, 1:2] * inv - mu * mu         # biased variance (training-mode BN)
    scale = gamma * jax.lax.rsqrt(var + EPS)
    shift = beta - mu * scale
    return scale, shift


# --------------------------------------------------------------------------------------
# Kernels (one grid step == one image)
# --------------------------------------------------------------------------------------
def conv1_kernel(x_ref, w1_ref, h1_ref, st1_ref):
    # x_ref: (1, Ci, P)   w1_ref: (Cm, Ci)   h1_ref: (1, Cm, P)   st1_ref: (1, Cm, 2)
    _, ci, p = x_ref.shape
    cm = w1_ref.shape[0]
    x = x_ref[...].reshape(ci, p).astype(COMPUTE_DTYPE)
    w = w1_ref[...].astype(COMPUTE_DTYPE)
    h = jnp.dot(w, x, preferred_element_type=jnp.float32)        # (Cm, P) on the MXU
    h1_ref[...] = h.reshape(1, cm, p)
    st1_ref[...] = _partial_stats(h)


def conv2_kernel(h1_ref, st1_ref, g1_ref, b1_ref, w2_ref, h2_ref, st2_ref):
    # h1_ref: (1, Cm, H, W)  st1_ref: (N, Cm, 2)  g1/b1: (Cm, 1)  w2_ref: (Cm, 9*Cm)
    _, cm, hgt, wid = h1_ref.shape
    count = st1_ref.shape[0] * hgt * wid
    scale, shift = _bn_scale_shift(st1_ref[...], g1_ref[...], b1_ref[...], count)
    a = h1_ref[...].reshape(cm, hgt, wid)
    a = jnp.maximum(a * scale.reshape(cm, 1, 1) + shift.reshape(cm, 1, 1), 0.0)

    # Zero-pad spatially by 1 on each side (built with concat; stays in vregs/VMEM).
    zc = jnp.zeros((cm, hgt, 1), a.dtype)
    zr = jnp.zeros((cm, 1, wid + 2), a.dtype)
    ap = jnp.concatenate([zc, a, zc], axis=2)
    ap = jnp.concatenate([zr, ap, zr], axis=1)                   # (Cm, H+2, W+2)

    # im2col: 9 shifted views stacked on the contraction axis -> ONE MXU matmul.
    cols = [ap[:, ky:ky + hgt, kx:kx + wid] for ky in range(3) for kx in range(3)]
    col = jnp.concatenate(cols, axis=0).reshape(9 * cm, hgt * wid)   # (9*Cm, P)
    y = jnp.dot(w2_ref[...].astype(COMPUTE_DTYPE), col.astype(COMPUTE_DTYPE),
                preferred_element_type=jnp.float32)              # (Cm, P)
    h2_ref[...] = y.reshape(1, cm, hgt * wid)
    st2_ref[...] = _partial_stats(y)


def conv3_kernel(h2_ref, st2_ref, g2_ref, b2_ref, w3_ref, h3_ref, st3_ref):
    # h2_ref: (1, Cm, P)  st2_ref: (N, Cm, 2)  g2/b2: (Cm, 1)  w3_ref: (Co, Cm)
    _, cm, p = h2_ref.shape
    co = w3_ref.shape[0]
    count = st2_ref.shape[0] * p
    scale, shift = _bn_scale_shift(st2_ref[...], g2_ref[...], b2_ref[...], count)
    a = jnp.maximum(h2_ref[...].reshape(cm, p) * scale + shift, 0.0).astype(COMPUTE_DTYPE)
    y = jnp.dot(w3_ref[...].astype(COMPUTE_DTYPE), a,
                preferred_element_type=jnp.float32)              # (Co, P)
    h3_ref[...] = y.reshape(1, co, p)
    st3_ref[...] = _partial_stats(y)


def finalize_kernel(h3_ref, st3_ref, g3_ref, b3_ref, x_ref, o_ref):
    # h3_ref: (1, Co, P)  st3_ref: (N, Co, 2)  g3/b3: (Co, 1)  x_ref: (1, Co, P)
    _, co, p = h3_ref.shape
    count = st3_ref.shape[0] * p
    scale, shift = _bn_scale_shift(st3_ref[...], g3_ref[...], b3_ref[...], count)
    y = h3_ref[...].reshape(co, p) * scale + shift
    out = jnp.maximum(y + x_ref[...].reshape(co, p), 0.0)        # residual add + relu (f32)
    o_ref[...] = out.reshape(1, co, p)


# --------------------------------------------------------------------------------------
# Wrapper
# --------------------------------------------------------------------------------------
def _cparams(step_bytes):
    # Explicit scoped-VMEM budget: double-buffered in/out blocks + headroom for in-kernel
    # intermediates (im2col slab, casts).  Clamped below v7x's 64 MiB physical VMEM.
    limit = int(min(max(4 * step_bytes + (8 << 20), 16 << 20), 48 << 20))
    return pltpu.CompilerParams(dimension_semantics=("parallel",),
                                vmem_limit_bytes=limit)


@jax.jit
def bottleneck_forward(x_nchw, w1, g1, b1, w2mat, g2, b2, w3, g3, b3):
    """x_nchw: (N, Ci, H, W).  gamma/beta are (C, 1).  Returns (N, Co, H, W)."""
    N, Ci, H, W = x_nchw.shape
    Cm = w1.shape[0]
    Co = w3.shape[0]
    assert Ci == Co, "stride=1 / down=None bottleneck requires in_planes == out_planes*4"
    P = H * W
    f32 = jnp.float32
    xf = x_nchw.reshape(N, Ci, P).astype(f32)    # contiguous reshape, NO transpose

    full = lambda arr: pl.BlockSpec(arr.shape, lambda n, nd=arr.ndim: (0,) * nd)
    img = lambda c: pl.BlockSpec((1, c, P), lambda n: (n, 0, 0))
    stat_spec = lambda c: pl.BlockSpec((1, c, 2), lambda n: (n, 0, 0))

    # ---- stage 1: conv1 (1x1) + partial bn1 stats ----
    h1, st1 = pl.pallas_call(
        conv1_kernel,
        grid=(N,),
        in_specs=[img(Ci), full(w1)],
        out_specs=(img(Cm), stat_spec(Cm)),
        out_shape=(jax.ShapeDtypeStruct((N, Cm, P), f32),
                   jax.ShapeDtypeStruct((N, Cm, 2), f32)),
        compiler_params=_cparams(4 * (Ci * P + Cm * P)),
    )(xf, w1)

    # ---- stage 2: bn1 + relu + conv2 (3x3, im2col) + partial bn2 stats ----
    h1_4d = h1.reshape(N, Cm, H, W)              # free reshape for spatial shifting
    h2, st2 = pl.pallas_call(
        conv2_kernel,
        grid=(N,),
        in_specs=[pl.BlockSpec((1, Cm, H, W), lambda n: (n, 0, 0, 0)),
                  full(st1), full(g1), full(b1), full(w2mat)],
        out_specs=(img(Cm), stat_spec(Cm)),
        out_shape=(jax.ShapeDtypeStruct((N, Cm, P), f32),
                   jax.ShapeDtypeStruct((N, Cm, 2), f32)),
        compiler_params=_cparams(4 * (2 * Cm * P) + 4 * (9 * Cm * P)),
    )(h1_4d, st1, g1, b1, w2mat)

    # ---- stage 3: bn2 + relu + conv3 (1x1) + partial bn3 stats ----
    h3, st3 = pl.pallas_call(
        conv3_kernel,
        grid=(N,),
        in_specs=[img(Cm), full(st2), full(g2), full(b2), full(w3)],
        out_specs=(img(Co), stat_spec(Co)),
        out_shape=(jax.ShapeDtypeStruct((N, Co, P), f32),
                   jax.ShapeDtypeStruct((N, Co, 2), f32)),
        compiler_params=_cparams(4 * (Cm * P + Co * P)),
    )(h2, st2, g2, b2, w3)

    # ---- stage 4: bn3 + residual add + relu ----
    out = pl.pallas_call(
        finalize_kernel,
        grid=(N,),
        in_specs=[img(Co), full(st3), full(g3), full(b3), img(Ci)],
        out_specs=img(Co),
        out_shape=jax.ShapeDtypeStruct((N, Co, P), f32),
        compiler_params=_cparams(4 * (3 * Co * P)),
    )(h3, st3, g3, b3, xf)

    return out.reshape(N, Co, H, W)              # NCHW out, matching the torch module


# --------------------------------------------------------------------------------------
# Pure-JAX reference (torch semantics: training-mode BN, biased variance)
# --------------------------------------------------------------------------------------
def _ref_bn(y, g, b):  # y: NCHW
    mu = jnp.mean(y, axis=(0, 2, 3), keepdims=True)
    var = jnp.mean((y - mu) ** 2, axis=(0, 2, 3), keepdims=True)
    return (y - mu) * jax.lax.rsqrt(var + EPS) * g.reshape(1, -1, 1, 1) + b.reshape(1, -1, 1, 1)


def _ref_conv(x, w, pad):  # x: NCHW, w: OIHW
    return jax.lax.conv_general_dilated(
        x, w, window_strides=(1, 1), padding=pad,
        dimension_numbers=("NCHW", "OIHW", "NCHW"))


def reference_forward(x, cw1, g1, b1, cw2, g2, b2, cw3, g3, b3):
    out = jnp.maximum(_ref_bn(_ref_conv(x, cw1, "VALID"), g1, b1), 0.0)
    out = jnp.maximum(_ref_bn(_ref_conv(out, cw2, ((1, 1), (1, 1))), g2, b2), 0.0)
    out = _ref_bn(_ref_conv(out, cw3, "VALID"), g3, b3)
    return jnp.maximum(out + x, 0.0)


if __name__ == "__main__":
    # in_planes = 16, out_planes = 4, expansion = 4 -> Co = 16 = Ci
    # (stride=1, down=None, so the residual add is shape-compatible).
    N, Ci, H, W = 2, 16, 8, 8
    Cm = 4
    Co = Cm * 4

    key = jax.random.PRNGKey(0)
    k = jax.random.split(key, 10)

    x = jax.random.normal(k[0], (N, Ci, H, W), jnp.float32)

    # PyTorch-layout conv weights (OIHW), deterministic init.
    cw1 = jax.random.normal(k[1], (Cm, Ci, 1, 1), jnp.float32) * 0.2
    cw2 = jax.random.normal(k[2], (Cm, Cm, 3, 3), jnp.float32) * 0.2
    cw3 = jax.random.normal(k[3], (Co, Cm, 1, 1), jnp.float32) * 0.2

    # BatchNorm affine params (non-trivial, deterministic).
    g1 = 1.0 + 0.1 * jax.random.normal(k[4], (Cm,), jnp.float32)
    b1 = 0.1 * jax.random.normal(k[5], (Cm,), jnp.float32)
    g2 = 1.0 + 0.1 * jax.random.normal(k[6], (Cm,), jnp.float32)
    b2 = 0.1 * jax.random.normal(k[7], (Cm,), jnp.float32)
    g3 = 1.0 + 0.1 * jax.random.normal(k[8], (Co,), jnp.float32)
    b3 = 0.1 * jax.random.normal(k[9], (Co,), jnp.float32)

    # Kernel-layout weights (derived from the OIHW tensors; activations never transposed).
    w1 = cw1[:, :, 0, 0]                                           # (Cm, Ci)
    w2mat = jnp.transpose(cw2, (0, 2, 3, 1)).reshape(Cm, 9 * Cm)   # (Cm, 9*Cm): cols = (ky,kx,ci)
    w3 = cw3[:, :, 0, 0]                                           # (Co, Cm)

    out = bottleneck_forward(
        x, w1, g1.reshape(-1, 1), b1.reshape(-1, 1),
        w2mat, g2.reshape(-1, 1), b2.reshape(-1, 1),
        w3, g3.reshape(-1, 1), b3.reshape(-1, 1))
    out = jax.block_until_ready(out)

    ref = jax.block_until_ready(
        reference_forward(x, cw1, g1, b1, cw2, g2, b2, cw3, g3, b3))

    assert out.shape == (N, Co, H, W), out.shape
    # bf16 MXU operands (f32 accumulation / BN / residual) -> slightly looser tolerance.
    np.testing.assert_allclose(np.asarray(out), np.asarray(ref), rtol=3e-2, atol=3e-2)

    print("KERNEL_OK")
</pallas_src>

<mosaic_0001>
module attributes {stable_mosaic.version = 11 : i64} {
  func.func @conv1_kernel(%arg0: i32, %arg1: memref<1x16x64xf32, #tpu.memory_space<vmem>>, %arg2: memref<4x16xf32, #tpu.memory_space<vmem>>, %arg3: memref<1x4x64xf32, #tpu.memory_space<vmem>>, %arg4: memref<1x4x2xf32, #tpu.memory_space<vmem>>) attributes {dimension_semantics = [#tpu.dimension_semantics<parallel>], iteration_bounds = array<i64: 2>, scalar_prefetch = 0 : i64, scratch_operands = 0 : i64, tpu.core_type = #tpu.core_type<tc>, window_params = [{transform_indices = @transform_0, window_bounds = array<i64: 1, 16, 64>}, {pipeline_mode = #tpu.pipeline_mode<synchronous>, transform_indices = @transform_1, window_bounds = array<i64: 4, 16>}, {transform_indices = @transform_2, window_bounds = array<i64: 1, 4, 64>}, {transform_indices = @transform_3, window_bounds = array<i64: 1, 4, 2>}]} {
    %c0 = arith.constant 0 : index
    %c0_0 = arith.constant 0 : index
    %c0_1 = arith.constant 0 : index
    %0 = vector.load %arg1[%c0, %c0_0, %c0_1] : memref<1x16x64xf32, #tpu.memory_space<vmem>>, vector<1x16x64xf32>
    %1 = vector.shape_cast %0 : vector<1x16x64xf32> to vector<16x64xf32>
    %2 = arith.truncf %1 : vector<16x64xf32> to vector<16x64xbf16>
    %c0_2 = arith.constant 0 : index
    %c0_3 = arith.constant 0 : index
    %3 = vector.load %arg2[%c0_2, %c0_3] : memref<4x16xf32, #tpu.memory_space<vmem>>, vector<4x16xf32>
    %4 = arith.truncf %3 : vector<4x16xf32> to vector<4x16xbf16>
    %cst = arith.constant dense<0.000000e+00> : vector<4x64xf32>
    %5 = tpu.matmul %4, %2, %cst {dimension_numbers = #tpu.dot_dimension_numbers<[1], [0], [0], [1], [0, 0, 1, 1], [], []>} : vector<4x16xbf16>, vector<16x64xbf16>, vector<4x64xf32> -> vector<4x64xf32>
    %6 = vector.shape_cast %5 : vector<4x64xf32> to vector<1x4x64xf32>
    %c0_4 = arith.constant 0 : index
    %c0_5 = arith.constant 0 : index
    %c0_6 = arith.constant 0 : index
    %7 = vector.load %arg3[%c0_4, %c0_5, %c0_6] : memref<1x4x64xf32, #tpu.memory_space<vmem>>, vector<1x4x64xf32>
    tpu.vector_store %arg3[%c0_4, %c0_5, %c0_6], %6 {strides = array<i32>} : memref<1x4x64xf32, #tpu.memory_space<vmem>>, vector<1x4x64xf32>,
    %cst_7 = arith.constant dense<0.000000e+00> : vector<4xf32>
    %8 = vector.multi_reduction <add>, %5, %cst_7 [1] : vector<4x64xf32> to vector<4xf32>
    %9 = vector.shape_cast %8 : vector<4xf32> to vector<4x1xf32>
    %10 = arith.mulf %5, %5 : vector<4x64xf32>
    %cst_8 = arith.constant dense<0.000000e+00> : vector<4xf32>
    %11 = vector.multi_reduction <add>, %10, %cst_8 [1] : vector<4x64xf32> to vector<4xf32>
    %12 = vector.shape_cast %11 : vector<4xf32> to vector<4x1xf32>
    %13 = tpu.concatenate %9, %12 in 1 : vector<4x1xf32>, vector<4x1xf32> -> vector<4x2xf32>
    %14 = vector.shape_cast %13 : vector<4x2xf32> to vector<1x4x2xf32>
    %c0_9 = arith.constant 0 : index
    %c0_10 = arith.constant 0 : index
    %c0_11 = arith.constant 0 : index
    %15 = vector.load %arg4[%c0_9, %c0_10, %c0_11] : memref<1x4x2xf32, #tpu.memory_space<vmem>>, vector<1x4x2xf32>
    tpu.vector_store %arg4[%c0_9, %c0_10, %c0_11], %14 {strides = array<i32>} : memref<1x4x2xf32, #tpu.memory_space<vmem>>, vector<1x4x2xf32>,
    return
  }
  func.func @transform_0(%arg0: i32) -> (i32, i32, i32) {
    %c0_i32 = arith.constant 0 : i32
    %c0_i32_0 = arith.constant 0 : i32
    %c0_i32_1 = arith.constant 0 : i32
    return %arg0, %c0_i32, %c0_i32_0 : i32, i32, i32
  }
  func.func @transform_1(%arg0: i32) -> (i32, i32) {
    %c0_i32 = arith.constant 0 : i32
    %c0_i32_0 = arith.constant 0 : i32
    %c0_i32_1 = arith.constant 0 : i32
    return %c0_i32, %c0_i32_0 : i32, i32
  }
  func.func @transform_2(%arg0: i32) -> (i32, i32, i32) {
    %c0_i32 = arith.constant 0 : i32
    %c0_i32_0 = arith.constant 0 : i32
    %c0_i32_1 = arith.constant 0 : i32
    return %arg0, %c0_i32, %c0_i32_0 : i32, i32, i32
  }
  func.func @transform_3(%arg0: i32) -> (i32, i32, i32) {
    %c0_i32 = arith.constant 0 : i32
    %c0_i32_0 = arith.constant 0 : i32
    %c0_i32_1 = arith.constant 0 : i32
    return %arg0, %c0_i32, %c0_i32_0 : i32, i32, i32
  }
}

module attributes {stable_mosaic.version = 11 : i64} {
  func.func @conv2_kernel(%arg0: i32, %arg1: memref<1x4x8x8xf32, #tpu.memory_space<vmem>>, %arg2: memref<2x4x2xf32, #tpu.memory_space<vmem>>, %arg3: memref<4x1xf32, #tpu.memory_space<vmem>>, %arg4: memref<4x1xf32, #tpu.memory_space<vmem>>, %arg5: memref<4x36xf32, #tpu.memory_space<vmem>>, %arg6: memref<1x4x64xf32, #tpu.memory_space<vmem>>, %arg7: memref<1x4x2xf32, #tpu.memory_space<vmem>>) attributes {dimension_semantics = [#tpu.dimension_semantics<parallel>], iteration_bounds = array<i64: 2>, scalar_prefetch = 0 : i64, scratch_operands = 0 : i64, tpu.core_type = #tpu.core_type<tc>, window_params = [{transform_indices = @transform_0, window_bounds = array<i64: 1, 4, 8, 8>}, {pipeline_mode = #tpu.pipeline_mode<synchronous>, transform_indices = @transform_1, window_bounds = array<i64: 2, 4, 2>}, {pipeline_mode = #tpu.pipeline_mode<synchronous>, transform_indices = @transform_2, window_bounds = array<i64: 4, 1>}, {pipeline_mode = #tpu.pipeline_mode<synchronous>, transform_indices = @transform_3, window_bounds = array<i64: 4, 1>}, {pipeline_mode = #tpu.pipeline_mode<synchronous>, transform_indices = @transform_4, window_bounds = array<i64: 4, 36>}, {transform_indices = @transform_5, window_bounds = array<i64: 1, 4, 64>}, {transform_indices = @transform_6, window_bounds = array<i64: 1, 4, 2>}]} {
    %c0 = arith.constant 0 : index
    %c0_0 = arith.constant 0 : index
    %c0_1 = arith.constant 0 : index
    %0 = vector.load %arg2[%c0, %c0_0, %c0_1] : memref<2x4x2xf32, #tpu.memory_space<vmem>>, vector<2x4x2xf32>
    %c0_2 = arith.constant 0 : index
    %c0_3 = arith.constant 0 : index
    %1 = vector.load %arg3[%c0_2, %c0_3] : memref<4x1xf32, #tpu.memory_space<vmem>>, vector<4x1xf32>
    %c0_4 = arith.constant 0 : index
    %c0_5 = arith.constant 0 : index
    %2 = vector.load %arg4[%c0_4, %c0_5] : memref<4x1xf32, #tpu.memory_space<vmem>>, vector<4x1xf32>
    %cst = arith.constant dense<0.000000e+00> : vector<4x2xf32>
    %3 = vector.multi_reduction <add>, %0, %cst [0] : vector<2x4x2xf32> to vector<4x2xf32>
    %4 = vector.extract_strided_slice %3 {offsets = [0, 0], sizes = [4, 1], strides = [1, 1]} : vector<4x2xf32> to vector<4x1xf32>
    %cst_6 = arith.constant 7.812500e-03 : f32
    %5 = vector.broadcast %cst_6 : f32 to vector<4x1xf32>
    %6 = arith.mulf %4, %5 : vector<4x1xf32>
    %7 = vector.extract_strided_slice %3 {offsets = [0, 1], sizes = [4, 1], strides = [1, 1]} : vector<4x2xf32> to vector<4x1xf32>
    %cst_7 = arith.constant 7.812500e-03 : f32
    %8 = vector.broadcast %cst_7 : f32 to vector<4x1xf32>
    %9 = arith.mulf %7, %8 : vector<4x1xf32>
    %10 = arith.mulf %6, %6 : vector<4x1xf32>
    %11 = arith.subf %9, %10 : vector<4x1xf32>
    %cst_8 = arith.constant 9.99999974E-6 : f32
    %12 = vector.broadcast %cst_8 : f32 to vector<4x1xf32>
    %13 = arith.addf %11, %12 : vector<4x1xf32>
    %14 = math.rsqrt %13 : vector<4x1xf32>
    %15 = arith.mulf %1, %14 : vector<4x1xf32>
    %16 = arith.mulf %6, %15 : vector<4x1xf32>
    %17 = arith.subf %2, %16 : vector<4x1xf32>
    %c0_9 = arith.constant 0 : index
    %c0_10 = arith.constant 0 : index
    %c0_11 = arith.constant 0 : index
    %c0_12 = arith.constant 0 : index
    %18 = vector.load %arg1[%c0_9, %c0_10, %c0_11, %c0_12] : memref<1x4x8x8xf32, #tpu.memory_space<vmem>>, vector<1x4x8x8xf32>
    %19 = vector.shape_cast %18 : vector<1x4x8x8xf32> to vector<4x8x8xf32>
    %20 = vector.shape_cast %15 : vector<4x1xf32> to vector<4x1x1xf32>
    %21 = vector.broadcast %20 : vector<4x1x1xf32> to vector<4x8x8xf32>
    %22 = arith.mulf %19, %21 : vector<4x8x8xf32>
    %23 = vector.shape_cast %17 : vector<4x1xf32> to vector<4x1x1xf32>
    %24 = vector.broadcast %23 : vector<4x1x1xf32> to vector<4x8x8xf32>
    %25 = arith.addf %22, %24 : vector<4x8x8xf32>
    %cst_13 = arith.constant 0.000000e+00 : f32
    %26 = vector.broadcast %cst_13 : f32 to vector<4x8x8xf32>
    %27 = arith.maximumf %25, %26 : vector<4x8x8xf32>
    %cst_14 = arith.constant 0.000000e+00 : f32
    %28 = vector.broadcast %cst_14 : f32 to vector<4x8x1xf32>
    %cst_15 = arith.constant 0.000000e+00 : f32
    %29 = vector.broadcast %cst_15 : f32 to vector<4x1x10xf32>
    %30 = tpu.concatenate %28, %27, %28 in 2 : vector<4x8x1xf32>, vector<4x8x8xf32>, vector<4x8x1xf32> -> vector<4x8x10xf32>
    %31 = tpu.concatenate %29, %30, %29 in 1 : vector<4x1x10xf32>, vector<4x8x10xf32>, vector<4x1x10xf32> -> vector<4x10x10xf32>
    %32 = vector.extract_strided_slice %31 {offsets = [0, 0, 0], sizes = [4, 8, 8], strides = [1, 1, 1]} : vector<4x10x10xf32> to vector<4x8x8xf32>
    %33 = vector.extract_strided_slice %31 {offsets = [0, 0, 1], sizes = [4, 8, 8], strides = [1, 1, 1]} : vector<4x10x10xf32> to vector<4x8x8xf32>
    %34 = vector.extract_strided_slice %31 {offsets = [0, 0, 2], sizes = [4, 8, 8], strides = [1, 1, 1]} : vector<4x10x10xf32> to vector<4x8x8xf32>
    %35 = vector.extract_strided_slice %31 {offsets = [0, 1, 0], sizes = [4, 8, 8], strides = [1, 1, 1]} : vector<4x10x10xf32> to vector<4x8x8xf32>
    %36 = vector.extract_strided_slice %31 {offsets = [0, 1, 1], sizes = [4, 8, 8], strides = [1, 1, 1]} : vector<4x10x10xf32> to vector<4x8x8xf32>
    %37 = vector.extract_strided_slice %31 {offsets = [0, 1, 2], sizes = [4, 8, 8], strides = [1, 1, 1]} : vector<4x10x10xf32> to vector<4x8x8xf32>
    %38 = vector.extract_strided_slice %31 {offsets = [0, 2, 0], sizes = [4, 8, 8], strides = [1, 1, 1]} : vector<4x10x10xf32> to vector<4x8x8xf32>
    %39 = vector.extract_strided_slice %31 {offsets = [0, 2, 1], sizes = [4, 8, 8], strides = [1, 1, 1]} : vector<4x10x10xf32> to vector<4x8x8xf32>
    %40 = vector.extract_strided_slice %31 {offsets = [0, 2, 2], sizes = [4, 8, 8], strides = [1, 1, 1]} : vector<4x10x10xf32> to vector<4x8x8xf32>
    %41 = tpu.concatenate %32, %33, %34, %35, %36, %37, %38, %39, %40 in 0 : vector<4x8x8xf32>, vector<4x8x8xf32>, vector<4x8x8xf32>, vector<4x8x8xf32>, vector<4x8x8xf32>, vector<4x8x8xf32>, vector<4x8x8xf32>, vector<4x8x8xf32>, vector<4x8x8xf32> -> vector<36x8x8xf32>
    %42 = vector.shape_cast %41 : vector<36x8x8xf32> to vector<36x64xf32>
    %c0_16 = arith.constant 0 : index
    %c0_17 = arith.constant 0 : index
    %43 = vector.load %arg5[%c0_16, %c0_17] : memref<4x36xf32, #tpu.memory_space<vmem>>, vector<4x36xf32>
    %44 = arith.truncf %43 : vector<4x36xf32> to vector<4x36xbf16>
    %45 = arith.truncf %42 : vector<36x64xf32> to vector<36x64xbf16>
    %cst_18 = arith.constant dense<0.000000e+00> : vector<4x64xf32>
    %46 = tpu.matmul %44, %45, %cst_18 {dimension_numbers = #tpu.dot_dimension_numbers<[1], [0], [0], [1], [0, 0, 1, 1], [], []>} : vector<4x36xbf16>, vector<36x64xbf16>, vector<4x64xf32> -> vector<4x64xf32>
    %47 = vector.shape_cast %46 : vector<4x64xf32> to vector<1x4x64xf32>
    %c0_19 = arith.constant 0 : index
    %c0_20 = arith.constant 0 : index
    %c0_21 = arith.constant 0 : index
    %48 = vector.load %arg6[%c0_19, %c0_20, %c0_21] : memref<1x4x64xf32, #tpu.memory_space<vmem>>, vector<1x4x64xf32>
    tpu.vector_store %arg6[%c0_19, %c0_20, %c0_21], %47 {strides = array<i32>} : memref<1x4x64xf32, #tpu.memory_space<vmem>>, vector<1x4x64xf32>,
    %cst_22 = arith.constant dense<0.000000e+00> : vector<4xf32>
    %49 = vector.multi_reduction <add>, %46, %cst_22 [1] : vector<4x64xf32> to vector<4xf32>
    %50 = vector.shape_cast %49 : vector<4xf32> to vector<4x1xf32>
    %51 = arith.mulf %46, %46 : vector<4x64xf32>
    %cst_23 = arith.constant dense<0.000000e+00> : vector<4xf32>
    %52 = vector.multi_reduction <add>, %51, %cst_23 [1] : vector<4x64xf32> to vector<4xf32>
    %53 = vector.shape_cast %52 : vector<4xf32> to vector<4x1xf32>
    %54 = tpu.concatenate %50, %53 in 1 : vector<4x1xf32>, vector<4x1xf32> -> vector<4x2xf32>
    %55 = vector.shape_cast %54 : vector<4x2xf32> to vector<1x4x2xf32>
    %c0_24 = arith.constant 0 : index
    %c0_25 = arith.constant 0 : index
    %c0_26 = arith.constant 0 : index
    %56 = vector.load %arg7[%c0_24, %c0_25, %c0_26] : memref<1x4x2xf32, #tpu.memory_space<vmem>>, vector<1x4x2xf32>
    tpu.vector_store %arg7[%c0_24, %c0_25, %c0_26], %55 {strides = array<i32>} : memref<1x4x2xf32, #tpu.memory_space<vmem>>, vector<1x4x2xf32>,
    return
  }
  func.func @transform_0(%arg0: i32) -> (i32, i32, i32, i32) {
    %c0_i32 = arith.constant 0 : i32
    %c0_i32_0 = arith.constant 0 : i32
    %c0_i32_1 = arith.constant 0 : i32
    %c0_i32_2 = arith.constant 0 : i32
    return %arg0, %c0_i32, %c0_i32_0, %c0_i32_1 : i32, i32, i32, i32
  }
  func.func @transform_1(%arg0: i32) -> (i32, i32, i32) {
    %c0_i32 = arith.constant 0 : i32
    %c0_i32_0 = arith.constant 0 : i32
    %c0_i32_1 = arith.constant 0 : i32
    %c0_i32_2 = arith.constant 0 : i32
    return %c0_i32, %c0_i32_0, %c0_i32_1 : i32, i32, i32
  }
  func.func @transform_2(%arg0: i32) -> (i32, i32) {
    %c0_i32 = arith.constant 0 : i32
    %c0_i32_0 = arith.constant 0 : i32
    %c0_i32_1 = arith.constant 0 : i32
    return %c0_i32, %c0_i32_0 : i32, i32
  }
  func.func @transform_3(%arg0: i32) -> (i32, i32) {
    %c0_i32 = arith.constant 0 : i32
    %c0_i32_0 = arith.constant 0 : i32
    %c0_i32_1 = arith.constant 0 : i32
    return %c0_i32, %c0_i32_0 : i32, i32
  }
  func.func @transform_4(%arg0: i32) -> (i32, i32) {
    %c0_i32 = arith.constant 0 : i32
    %c0_i32_0 = arith.constant 0 : i32
    %c0_i32_1 = arith.constant 0 : i32
    return %c0_i32, %c0_i32_0 : i32, i32
  }
  func.func @transform_5(%arg0: i32) -> (i32, i32, i32) {
    %c0_i32 = arith.constant 0 : i32
    %c0_i32_0 = arith.constant 0 : i32
    %c0_i32_1 = arith.constant 0 : i32
    return %arg0, %c0_i32, %c0_i32_0 : i32, i32, i32
  }
  func.func @transform_6(%arg0: i32) -> (i32, i32, i32) {
    %c0_i32 = arith.constant 0 : i32
    %c0_i32_0 = arith.constant 0 : i32
    %c0_i32_1 = arith.constant 0 : i32
    return %arg0, %c0_i32, %c0_i32_0 : i32, i32, i32
  }
}

module attributes {stable_mosaic.version = 11 : i64} {
  func.func @conv3_kernel(%arg0: i32, %arg1: memref<1x4x64xf32, #tpu.memory_space<vmem>>, %arg2: memref<2x4x2xf32, #tpu.memory_space<vmem>>, %arg3: memref<4x1xf32, #tpu.memory_space<vmem>>, %arg4: memref<4x1xf32, #tpu.memory_space<vmem>>, %arg5: memref<16x4xf32, #tpu.memory_space<vmem>>, %arg6: memref<1x16x64xf32, #tpu.memory_space<vmem>>, %arg7: memref<1x16x2xf32, #tpu.memory_space<vmem>>) attributes {dimension_semantics = [#tpu.dimension_semantics<parallel>], iteration_bounds = array<i64: 2>, scalar_prefetch = 0 : i64, scratch_operands = 0 : i64, tpu.core_type = #tpu.core_type<tc>, window_params = [{transform_indices = @transform_0, window_bounds = array<i64: 1, 4, 64>}, {pipeline_mode = #tpu.pipeline_mode<synchronous>, transform_indices = @transform_1, window_bounds = array<i64: 2, 4, 2>}, {pipeline_mode = #tpu.pipeline_mode<synchronous>, transform_indices = @transform_2, window_bounds = array<i64: 4, 1>}, {pipeline_mode = #tpu.pipeline_mode<synchronous>, transform_indices = @transform_3, window_bounds = array<i64: 4, 1>}, {pipeline_mode = #tpu.pipeline_mode<synchronous>, transform_indices = @transform_4, window_bounds = array<i64: 16, 4>}, {transform_indices = @transform_5, window_bounds = array<i64: 1, 16, 64>}, {transform_indices = @transform_6, window_bounds = array<i64: 1, 16, 2>}]} {
    %c0 = arith.constant 0 : index
    %c0_0 = arith.constant 0 : index
    %c0_1 = arith.constant 0 : index
    %0 = vector.load %arg2[%c0, %c0_0, %c0_1] : memref<2x4x2xf32, #tpu.memory_space<vmem>>, vector<2x4x2xf32>
    %c0_2 = arith.constant 0 : index
    %c0_3 = arith.constant 0 : index
    %1 = vector.load %arg3[%c0_2, %c0_3] : memref<4x1xf32, #tpu.memory_space<vmem>>, vector<4x1xf32>
    %c0_4 = arith.constant 0 : index
    %c0_5 = arith.constant 0 : index
    %2 = vector.load %arg4[%c0_4, %c0_5] : memref<4x1xf32, #tpu.memory_space<vmem>>, vector<4x1xf32>
    %cst = arith.constant dense<0.000000e+00> : vector<4x2xf32>
    %3 = vector.multi_reduction <add>, %0, %cst [0] : vector<2x4x2xf32> to vector<4x2xf32>
    %4 = vector.extract_strided_slice %3 {offsets = [0, 0], sizes = [4, 1], strides = [1, 1]} : vector<4x2xf32> to vector<4x1xf32>
    %cst_6 = arith.constant 7.812500e-03 : f32
    %5 = vector.broadcast %cst_6 : f32 to vector<4x1xf32>
    %6 = arith.mulf %4, %5 : vector<4x1xf32>
    %7 = vector.extract_strided_slice %3 {offsets = [0, 1], sizes = [4, 1], strides = [1, 1]} : vector<4x2xf32> to vector<4x1xf32>
    %cst_7 = arith.constant 7.812500e-03 : f32
    %8 = vector.broadcast %cst_7 : f32 to vector<4x1xf32>
    %9 = arith.mulf %7, %8 : vector<4x1xf32>
    %10 = arith.mulf %6, %6 : vector<4x1xf32>
    %11 = arith.subf %9, %10 : vector<4x1xf32>
    %cst_8 = arith.constant 9.99999974E-6 : f32
    %12 = vector.broadcast %cst_8 : f32 to vector<4x1xf32>
    %13 = arith.addf %11, %12 : vector<4x1xf32>
    %14 = math.rsqrt %13 : vector<4x1xf32>
    %15 = arith.mulf %1, %14 : vector<4x1xf32>
    %16 = arith.mulf %6, %15 : vector<4x1xf32>
    %17 = arith.subf %2, %16 : vector<4x1xf32>
    %c0_9 = arith.constant 0 : index
    %c0_10 = arith.constant 0 : index
    %c0_11 = arith.constant 0 : index
    %18 = vector.load %arg1[%c0_9, %c0_10, %c0_11] : memref<1x4x64xf32, #tpu.memory_space<vmem>>, vector<1x4x64xf32>
    %19 = vector.shape_cast %18 : vector<1x4x64xf32> to vector<4x64xf32>
    %20 = vector.broadcast %15 : vector<4x1xf32> to vector<4x64xf32>
    %21 = arith.mulf %19, %20 : vector<4x64xf32>
    %22 = vector.broadcast %17 : vector<4x1xf32> to vector<4x64xf32>
    %23 = arith.addf %21, %22 : vector<4x64xf32>
    %cst_12 = arith.constant 0.000000e+00 : f32
    %24 = vector.broadcast %cst_12 : f32 to vector<4x64xf32>
    %25 = arith.maximumf %23, %24 : vector<4x64xf32>
    %26 = arith.truncf %25 : vector<4x64xf32> to vector<4x64xbf16>
    %c0_13 = arith.constant 0 : index
    %c0_14 = arith.constant 0 : index
    %27 = vector.load %arg5[%c0_13, %c0_14] : memref<16x4xf32, #tpu.memory_space<vmem>>, vector<16x4xf32>
    %28 = arith.truncf %27 : vector<16x4xf32> to vector<16x4xbf16>
    %cst_15 = arith.constant dense<0.000000e+00> : vector<16x64xf32>
    %29 = tpu.matmul %28, %26, %cst_15 {dimension_numbers = #tpu.dot_dimension_numbers<[1], [0], [0], [1], [0, 0, 1, 1], [], []>} : vector<16x4xbf16>, vector<4x64xbf16>, vector<16x64xf32> -> vector<16x64xf32>
    %30 = vector.shape_cast %29 : vector<16x64xf32> to vector<1x16x64xf32>
    %c0_16 = arith.constant 0 : index
    %c0_17 = arith.constant 0 : index
    %c0_18 = arith.constant 0 : index
    %31 = vector.load %arg6[%c0_16, %c0_17, %c0_18] : memref<1x16x64xf32, #tpu.memory_space<vmem>>, vector<1x16x64xf32>
    tpu.vector_store %arg6[%c0_16, %c0_17, %c0_18], %30 {strides = array<i32>} : memref<1x16x64xf32, #tpu.memory_space<vmem>>, vector<1x16x64xf32>,
    %cst_19 = arith.constant dense<0.000000e+00> : vector<16xf32>
    %32 = vector.multi_reduction <add>, %29, %cst_19 [1] : vector<16x64xf32> to vector<16xf32>
    %33 = vector.shape_cast %32 : vector<16xf32> to vector<16x1xf32>
    %34 = arith.mulf %29, %29 : vector<16x64xf32>
    %cst_20 = arith.constant dense<0.000000e+00> : vector<16xf32>
    %35 = vector.multi_reduction <add>, %34, %cst_20 [1] : vector<16x64xf32> to vector<16xf32>
    %36 = vector.shape_cast %35 : vector<16xf32> to vector<16x1xf32>
    %37 = tpu.concatenate %33, %36 in 1 : vector<16x1xf32>, vector<16x1xf32> -> vector<16x2xf32>
    %38 = vector.shape_cast %37 : vector<16x2xf32> to vector<1x16x2xf32>
    %c0_21 = arith.constant 0 : index
    %c0_22 = arith.constant 0 : index
    %c0_23 = arith.constant 0 : index
    %39 = vector.load %arg7[%c0_21, %c0_22, %c0_23] : memref<1x16x2xf32, #tpu.memory_space<vmem>>, vector<1x16x2xf32>
    tpu.vector_store %arg7[%c0_21, %c0_22, %c0_23], %38 {strides = array<i32>} : memref<1x16x2xf32, #tpu.memory_space<vmem>>, vector<1x16x2xf32>,
    return
  }
  func.func @transform_0(%arg0: i32) -> (i32, i32, i32) {
    %c0_i32 = arith.constant 0 : i32
    %c0_i32_0 = arith.constant 0 : i32
    %c0_i32_1 = arith.constant 0 : i32
    return %arg0, %c0_i32, %c0_i32_0 : i32, i32, i32
  }
  func.func @transform_1(%arg0: i32) -> (i32, i32, i32) {
    %c0_i32 = arith.constant 0 : i32
    %c0_i32_0 = arith.constant 0 : i32
    %c0_i32_1 = arith.constant 0 : i32
    %c0_i32_2 = arith.constant 0 : i32
    return %c0_i32, %c0_i32_0, %c0_i32_1 : i32, i32, i32
  }
  func.func @transform_2(%arg0: i32) -> (i32, i32) {
    %c0_i32 = arith.constant 0 : i32
    %c0_i32_0 = arith.constant 0 : i32
    %c0_i32_1 = arith.constant 0 : i32
    return %c0_i32, %c0_i32_0 : i32, i32
  }
  func.func @transform_3(%arg0: i32) -> (i32, i32) {
    %c0_i32 = arith.constant 0 : i32
    %c0_i32_0 = arith.constant 0 : i32
    %c0_i32_1 = arith.constant 0 : i32
    return %c0_i32, %c0_i32_0 : i32, i32
  }
  func.func @transform_4(%arg0: i32) -> (i32, i32) {
    %c0_i32 = arith.constant 0 : i32
    %c0_i32_0 = arith.constant 0 : i32
    %c0_i32_1 = arith.constant 0 : i32
    return %c0_i32, %c0_i32_0 : i32, i32
  }
  func.func @transform_5(%arg0: i32) -> (i32, i32, i32) {
    %c0_i32 = arith.constant 0 : i32
    %c0_i32_0 = arith.constant 0 : i32
    %c0_i32_1 = arith.constant 0 : i32
    return %arg0, %c0_i32, %c0_i32_0 : i32, i32, i32
  }
  func.func @transform_6(%arg0: i32) -> (i32, i32, i32) {
    %c0_i32 = arith.constant 0 : i32
    %c0_i32_0 = arith.constant 0 : i32
    %c0_i32_1 = arith.constant 0 : i32
    return %arg0, %c0_i32, %c0_i32_0 : i32, i32, i32
  }
}

module attributes {stable_mosaic.version = 11 : i64} {
  func.func @finalize_kernel(%arg0: i32, %arg1: memref<1x16x64xf32, #tpu.memory_space<vmem>>, %arg2: memref<2x16x2xf32, #tpu.memory_space<vmem>>, %arg3: memref<16x1xf32, #tpu.memory_space<vmem>>, %arg4: memref<16x1xf32, #tpu.memory_space<vmem>>, %arg5: memref<1x16x64xf32, #tpu.memory_space<vmem>>, %arg6: memref<1x16x64xf32, #tpu.memory_space<vmem>>) attributes {dimension_semantics = [#tpu.dimension_semantics<parallel>], iteration_bounds = array<i64: 2>, scalar_prefetch = 0 : i64, scratch_operands = 0 : i64, tpu.core_type = #tpu.core_type<tc>, window_params = [{transform_indices = @transform_0, window_bounds = array<i64: 1, 16, 64>}, {pipeline_mode = #tpu.pipeline_mode<synchronous>, transform_indices = @transform_1, window_bounds = array<i64: 2, 16, 2>}, {pipeline_mode = #tpu.pipeline_mode<synchronous>, transform_indices = @transform_2, window_bounds = array<i64: 16, 1>}, {pipeline_mode = #tpu.pipeline_mode<synchronous>, transform_indices = @transform_3, window_bounds = array<i64: 16, 1>}, {transform_indices = @transform_4, window_bounds = array<i64: 1, 16, 64>}, {transform_indices = @transform_5, window_bounds = array<i64: 1, 16, 64>}]} {
    %c0 = arith.constant 0 : index
    %c0_0 = arith.constant 0 : index
    %c0_1 = arith.constant 0 : index
    %0 = vector.load %arg2[%c0, %c0_0, %c0_1] : memref<2x16x2xf32, #tpu.memory_space<vmem>>, vector<2x16x2xf32>
    %c0_2 = arith.constant 0 : index
    %c0_3 = arith.constant 0 : index
    %1 = vector.load %arg3[%c0_2, %c0_3] : memref<16x1xf32, #tpu.memory_space<vmem>>, vector<16x1xf32>
    %c0_4 = arith.constant 0 : index
    %c0_5 = arith.constant 0 : index
    %2 = vector.load %arg4[%c0_4, %c0_5] : memref<16x1xf32, #tpu.memory_space<vmem>>, vector<16x1xf32>
    %cst = arith.constant dense<0.000000e+00> : vector<16x2xf32>
    %3 = vector.multi_reduction <add>, %0, %cst [0] : vector<2x16x2xf32> to vector<16x2xf32>
    %4 = vector.extract_strided_slice %3 {offsets = [0, 0], sizes = [16, 1], strides = [1, 1]} : vector<16x2xf32> to vector<16x1xf32>
    %cst_6 = arith.constant 7.812500e-03 : f32
    %5 = vector.broadcast %cst_6 : f32 to vector<16x1xf32>
    %6 = arith.mulf %4, %5 : vector<16x1xf32>
    %7 = vector.extract_strided_slice %3 {offsets = [0, 1], sizes = [16, 1], strides = [1, 1]} : vector<16x2xf32> to vector<16x1xf32>
    %cst_7 = arith.constant 7.812500e-03 : f32
    %8 = vector.broadcast %cst_7 : f32 to vector<16x1xf32>
    %9 = arith.mulf %7, %8 : vector<16x1xf32>
    %10 = arith.mulf %6, %6 : vector<16x1xf32>
    %11 = arith.subf %9, %10 : vector<16x1xf32>
    %cst_8 = arith.constant 9.99999974E-6 : f32
    %12 = vector.broadcast %cst_8 : f32 to vector<16x1xf32>
    %13 = arith.addf %11, %12 : vector<16x1xf32>
    %14 = math.rsqrt %13 : vector<16x1xf32>
    %15 = arith.mulf %1, %14 : vector<16x1xf32>
    %16 = arith.mulf %6, %15 : vector<16x1xf32>
    %17 = arith.subf %2, %16 : vector<16x1xf32>
    %c0_9 = arith.constant 0 : index
    %c0_10 = arith.constant 0 : index
    %c0_11 = arith.constant 0 : index
    %18 = vector.load %arg1[%c0_9, %c0_10, %c0_11] : memref<1x16x64xf32, #tpu.memory_space<vmem>>, vector<1x16x64xf32>
    %19 = vector.shape_cast %18 : vector<1x16x64xf32> to vector<16x64xf32>
    %20 = vector.broadcast %15 : vector<16x1xf32> to vector<16x64xf32>
    %21 = arith.mulf %19, %20 : vector<16x64xf32>
    %22 = vector.broadcast %17 : vector<16x1xf32> to vector<16x64xf32>
    %23 = arith.addf %21, %22 : vector<16x64xf32>
    %c0_12 = arith.constant 0 : index
    %c0_13 = arith.constant 0 : index
    %c0_14 = arith.constant 0 : index
    %24 = vector.load %arg5[%c0_12, %c0_13, %c0_14] : memref<1x16x64xf32, #tpu.memory_space<vmem>>, vector<1x16x64xf32>
    %25 = vector.shape_cast %24 : vector<1x16x64xf32> to vector<16x64xf32>
    %26 = arith.addf %23, %25 : vector<16x64xf32>
    %cst_15 = arith.constant 0.000000e+00 : f32
    %27 = vector.broadcast %cst_15 : f32 to vector<16x64xf32>
    %28 = arith.maximumf %26, %27 : vector<16x64xf32>
    %29 = vector.shape_cast %28 : vector<16x64xf32> to vector<1x16x64xf32>
    %c0_16 = arith.constant 0 : index
    %c0_17 = arith.constant 0 : index
    %c0_18 = arith.constant 0 : index
    %30 = vector.load %arg6[%c0_16, %c0_17, %c0_18] : memref<1x16x64xf32, #tpu.memory_space<vmem>>, vector<1x16x64xf32>
    tpu.vector_store %arg6[%c0_16, %c0_17, %c0_18], %29 {strides = array<i32>} : memref<1x16x64xf32, #tpu.memory_space<vmem>>, vector<1x16x64xf32>,
    return
  }
  func.func @transform_0(%arg0: i32) -> (i32, i32, i32) {
    %c0_i32 = arith.constant 0 : i32
    %c0_i32_0 = arith.constant 0 : i32
    %c0_i32_1 = arith.constant 0 : i32
    return %arg0, %c0_i32, %c0_i32_0 : i32, i32, i32
  }
  func.func @transform_1(%arg0: i32) -> (i32, i32, i32) {
    %c0_i32 = arith.constant 0 : i32
    %c0_i32_0 = arith.constant 0 : i32
    %c0_i32_1 = arith.constant 0 : i32
    %c0_i32_2 = arith.constant 0 : i32
    return %c0_i32, %c0_i32_0, %c0_i32_1 : i32, i32, i32
  }
  func.func @transform_2(%arg0: i32) -> (i32, i32) {
    %c0_i32 = arith.constant 0 : i32
    %c0_i32_0 = arith.constant 0 : i32
    %c0_i32_1 = arith.constant 0 : i32
    return %c0_i32, %c0_i32_0 : i32, i32
  }
  func.func @transform_3(%arg0: i32) -> (i32, i32) {
    %c0_i32 = arith.constant 0 : i32
    %c0_i32_0 = arith.constant 0 : i32
    %c0_i32_1 = arith.constant 0 : i32
    return %c0_i32, %c0_i32_0 : i32, i32
  }
  func.func @transform_4(%arg0: i32) -> (i32, i32, i32) {
    %c0_i32 = arith.constant 0 : i32
    %c0_i32_0 = arith.constant 0 : i32
    %c0_i32_1 = arith.constant 0 : i32
    return %arg0, %c0_i32, %c0_i32_0 : i32, i32, i32
  }
  func.func @transform_5(%arg0: i32) -> (i32, i32, i32) {
    %c0_i32 = arith.constant 0 : i32
    %c0_i32_0 = arith.constant 0 : i32
    %c0_i32_1 = arith.constant 0 : i32
    return %arg0, %c0_i32, %c0_i32_0 : i32, i32, i32
  }
}

</mosaic_0001>

<bundles_post_ra>
// kernel: bottleneck_forward.4
= control target key start
LH: loop header
LB: loop body
LE: loop exit
PB: predicated region body
PF: predicated region fallthrough
CT: control target
= control target key end

     0   :  { %s388_s12 = smov 0   ;;  %s411_s0 = inlined_call_operand.vmem [shape: f32[2,16,64], index: 0, kind: input, shape index: {}]   ;;  %s412_s1 = inlined_call_operand.vmem [shape: f32[4,16], index: 1, kind: input, shape index: {}]   ;;  %s413_s2 = inlined_call_operand.vmem [shape: f32[2,4,64], index: 2, kind: output, shape index: {0}]   ;;  %s414_s3 = inlined_call_operand.vmem [shape: f32[2,4,2], index: 3, kind: output, shape index: {1}]  }
   0x1 LB: > { %s327_s13 = sadd.s32 4294967295, %s364_s12   ;;  %p331_p0 = scmp.ge.s32.totalorder %s364_s12, 1  ;;  %s364_s12 = sphi %s388_s12, %s14_s12  }
   0x2   : > { %p140_p1 = scmp.lt.s32.totalorder %s364_s12, 3 }
   0x4   : > { %p141_p2 = pnand %p331_p0, %p140_p1 }
   0x5   : > { %p167_p3 = scmp.lt.s32.totalorder (!%p141_p2), %s327_s13, 1  ;;  %v366_v0 = vmov (!%p141_p2), 0.0   ;;  %vm367_vm0 = vmmov (!%p141_p2), 0   ;;  %v184_v1 = vld [vmem:[%s412_s1] sm:$0xf] (!%p141_p2)  ;;  %vm186_vm1 = vcmask (!%p141_p2), 130048  }
   0x6   : > { %144 = sbr.rel (%p141_p2) target bundleno = 383 (0x17f), region = 28  ;;  %342 = vmatprep.subr.bf16.mxu0 (!%p141_p2), %v366_v0  ;;  %344 = vmatprep.mubr.msk.bf16.mxu0 (!%p141_p2), %vm367_vm0, %v366_v0  ;;  %v185_v5 = vpack.c.bf16 (!%p141_p2), %v184_v1, %v184_v1  ;;  %vm230_vm2 = vcmask (!%p141_p2), 519168   ;;  %vm239_vm3 = vcmask (!%p141_p2), 7168   ;;  %vm241_vm4 = vcmask (!%p141_p2), 11264  }
   0xd   : > { %s416_s13 = smov (!%p167_p3, %s327_s13), 1 }
   0xe   : > { %s339_s14 = sshll.u32 %s416_s13, 4  ;;  %s334_s20 = sshll.u32 %s416_s13, 2 }
   0xf   : > { %s171_s17 = scalar_lea.vmem %s411_s0, %s339_s14  ;;  %s175_s23 = scalar_lea.vmem %s413_s2, %s334_s20 }
  0x10   : > { %v181_v2 = vld [vmem:[%s171_s17] sm:$0xff]  ;;  %v182_v3 = vld [vmem:[%s171_s17 + $0x8] sm:$0xff]  ;;  %s179_s26 = scalar_lea.vmem %s414_s3, %s334_s20 }
  0x11   : > { %v183_v4 = vpack.c.bf16 %v182_v3, %v181_v2 }
  0x13   : > { %343 = vmatpush3.bf16.msra.mxu0 %v183_v4 }
  0x16   : > { %345 = vmatmul.mubr.msk.bf16.vlgmr.msra.gmra.mrb[0].mxu0 %vm186_vm1, %v185_v5 }
  0xe9   : > { %v224_v6 = vpop.f32.mrb[0].mxu0 }
  0xea   : > { %v346_v7 = vpop.f32.mrb[1].mxu0  ;;  %v232_v8 = vsel %vm230_vm2, %v224_v6, 0.0  ;;  %231 = vst.msk [vmem:[%s175_s23] sm:$0xf] %vm230_vm2, %v224_v6  ;;  %v235_v9 = vmul.f32 %v224_v6, %v224_v6 }
  0xeb   : > { %233 = vadd.xlane.f32.xlu0 %v232_v8  ;;  %v227_v10 = vpop.f32.mrb[2].mxu0 }
  0xec   : > { %v347_v11 = vpop.f32.mrb[3].mxu0  ;;  %v236_v12 = vsel %vm230_vm2, %v235_v9, 0.0 }
  0xef   : > { %237 = vadd.xlane.f32.xlu0 %v236_v12 }
 0x178   : > { %v234_v13 = vpop.xlane.xlu0 %233 }
 0x17c   : > { %v238_v14 = vpop.xlane.xlu0 %237 }
 0x17d   : > { %v240_v15 = vsel %vm239_vm3, %v234_v13, %v238_v14 }
 0x17e   : > { %242 = vst.msk [vmem:[%s179_s26] sm:$0xf] %vm241_vm4, %v240_v15 }
 0x17f PF: > { %s14_s12 = sadd.s32 1, %s364_s12  }
 0x180   : > { %p11_p4 = scmp.ge.s32.totalorder %s14_s12, 4  }
 0x182   :  { %13 = sbr.rel (!%p11_p4) target bundleno = 1 (0x1), region = 70 }

// kernel: bottleneck_forward.7
= control target key start
LH: loop header
LB: loop body
LE: loop exit
PB: predicated region body
PF: predicated region fallthrough
CT: control target
= control target key end

     0   :  { %s468_s18 = smov 0   ;;  %s516_s0 = inlined_call_operand.vmem [shape: f32[2,16,64], index: 0, kind: input, shape index: {}]   ;;  %s517_s1 = inlined_call_operand.vmem [shape: f32[2,16,2], index: 1, kind: input, shape index: {}]   ;;  %s518_s2 = inlined_call_operand.vmem [shape: f32[16,1], index: 2, kind: input, shape index: {}]   ;;  %s519_s3 = inlined_call_operand.vmem [shape: f32[16,1], index: 3, kind: input, shape index: {}]   ;;  %s520_s4 = inlined_call_operand.vmem [shape: f32[2,16,64], index: 4, kind: input, shape index: {}]   ;;  %s521_s5 = inlined_call_operand.vmem [shape: f32[2,16,64], index: 5, kind: output, shape index: {}]  }
   0x1 LB: > { %s394_s19 = sadd.s32 4294967295, %s433_s18   ;;  %p398_p0 = scmp.ge.s32.totalorder %s433_s18, 1  ;;  %s433_s18 = sphi %s468_s18, %s15_s18  }
   0x2   : > { %p197_p1 = scmp.lt.s32.totalorder %s433_s18, 3 }
   0x4   : > { %p198_p2 = pnand %p398_p0, %p197_p1 }
   0x5   : > { %v245_v0 = vld [vmem:[%s517_s1] sm:$0xff] (!%p198_p2)  ;;  %v247_v1 = vld [vmem:[%s517_s1 + $0x10] sm:$0xff] (!%p198_p2)  ;;  %vm253_vm0 = vcmask (!%p198_p2), 15360   ;;  %v246_v2 = vld [vmem:[%s517_s1 + $0x8] sm:$0xff] (!%p198_p2)  ;;  %s435_s28 = smov (!%p198_p2), 1   ;;  %v436_v18 = vmov (!%p198_p2), 0  }
   0x6   : > { %201 = sbr.rel (%p198_p2) target bundleno = 403 (0x193), region = 40  ;;  %v254_v3 = vsel (!%p198_p2), %vm253_vm0, %v245_v0, 0.0  ;;  %v255_v4 = vsel (!%p198_p2), %vm253_vm0, %v247_v1, 0.0  ;;  %v248_v5 = vld [vmem:[%s517_s1 + $0x18] sm:$0xff] (!%p198_p2)  ;;  %v257_v6 = vsel (!%p198_p2), %vm253_vm0, %v246_v2, 0.0  ;;  %421 = vset.pattern.permute.xlu0 (!%p198_p2), %v436_v18  ;;  %422 = vset.pattern.permute.xlu1 (!%p198_p2), %v436_v18  ;;  %s437_s29 = smov (!%p198_p2), 127  }
   0x7   : > { %v256_v7 = vadd.f32 (!%p198_p2), %v255_v4, %v254_v3  ;;  %v258_v8 = vsel (!%p198_p2), %vm253_vm0, %v248_v5, 0.0  ;;  %v249_v23 = vld [vmem:[%s518_s2] sm:$0xff] (!%p198_p2)  ;;  %v250_v26 = vld [vmem:[%s518_s2 + $0x8] sm:$0xff] (!%p198_p2)  ;;  %p230_p3 = scmp.lt.s32.totalorder (!%p198_p2), %s394_s19, 1  ;;  %vm324_vm1 = vcmask (!%p198_p2), 523264  }
   0x8   : > { %v259_v9 = vadd.f32 (!%p198_p2), %v258_v8, %v257_v6  ;;  %v251_v30 = vld [vmem:[%s519_s3] sm:$0xff] (!%p198_p2)  ;;  %v252_v31 = vld [vmem:[%s519_s3 + $0x8] sm:$0xff] (!%p198_p2) }
   0x9   : > { %v260_v10 = vmul.f32 (!%p198_p2), 0.0078125, %v256_v7 }
   0xa   : > { %v261_v11 = vmul.f32 (!%p198_p2), 0.0078125, %v259_v9 }
   0xb   : > { %v262_v12 = vmul.f32 (!%p198_p2), %v260_v10, %v260_v10 }
   0xc   : > { %v263_v13 = vmul.f32 (!%p198_p2), %v261_v11, %v261_v11 }
   0xd   : > { %266 = vrot.lane.b32.xlu0 %v262_v12, %s435_s28  ;;  %s523_s19 = smov (!%p230_p3, %s394_s19), 1 }
   0xe   : > { %s407_s13 = sshll.u32 %s523_s19, 4 }
   0xf   : > { %s234_s16 = scalar_lea.vmem %s516_s0, %s407_s13  ;;  %s239_s21 = scalar_lea.vmem %s520_s4, %s407_s13 }
  0x10   : > { %v292_v36 = vld [vmem:[%s234_s16] sm:$0xff]  ;;  %v293_v38 = vld [vmem:[%s234_s16 + $0x8] sm:$0xff]  ;;  %s244_s23 = scalar_lea.vmem %s521_s5, %s407_s13 }
  0x11   : > { %268 = vrot.lane.b32.xlu0 %v263_v13, %s435_s28  ;;  %v318_v42 = vld [vmem:[%s239_s21] sm:$0xff]  ;;  %v319_v44 = vld [vmem:[%s239_s21 + $0x8] sm:$0xff] }
  0x7f   : > { %v267_v14 = vpop.permute.xlu0 %266 }
  0x80   : > { %v272_v15 = vsub.f32 %v260_v10, %v267_v14 }
  0x82   : > { %v274_v16 = vadd.f32 1e-05, %v272_v15 }
  0x83   : > { %v269_v17 = vpop.permute.xlu0 %268 }
  0x84   : > { %423 = vrsqrt.f32 %v274_v16  ;;  %v273_v19 = vsub.f32 %v261_v11, %v269_v17 }
  0x86   : > { %v275_v20 = vadd.f32 1e-05, %v273_v19 }
  0x88   : > { %425 = vrsqrt.f32 %v275_v20 }
  0x8e   : > { %v424_v21 = vpop.eup %423 }
  0x8f   : > { %280 = vrot.lane.b32.xlu1 %v424_v21, %s437_s29 }
  0x92   : > { %v426_v22 = vpop.eup %425 }
  0x93   : > { %282 = vrot.lane.b32.xlu1 %v426_v22, %s437_s29 }
 0x101   : > { %v281_v24 = vpop.permute.xlu1 %280 }
 0x102   : > { %v286_v25 = vmul.f32 %v281_v24, %v249_v23 }
 0x104   : > { %296 = vperm.xlu0 %421, %v286_v25   ;;  %v288_v28 = vmul.f32 %v286_v25, %v260_v10 }
 0x105   : > { %v283_v27 = vpop.permute.xlu1 %282 }
 0x106   : > { %v287_v29 = vmul.f32 %v283_v27, %v250_v26  ;;  %v290_v33 = vsub.f32 %v251_v30, %v288_v28 }
 0x108   : > { %v289_v32 = vmul.f32 %v287_v29, %v261_v11  ;;  %301 = vperm.xlu1 %422, %v287_v29  }
 0x10a   : > { %v291_v34 = vsub.f32 %v252_v31, %v289_v32 }
 0x10c   : > { %308 = vperm.xlu1 %422, %v290_v33   ;;  %313 = vperm.xlu0 %421, %v291_v34  }
 0x183   : > { %v297_v35 = vpop.permute.xlu0 %296 }
 0x184   : > { %v304_v39 = vmul.f32 %v297_v35, %v292_v36 }
 0x187   : > { %v302_v37 = vpop.permute.xlu1 %301 }
 0x188   : > { %v305_v40 = vmul.f32 %v302_v37, %v293_v38 }
 0x18b   : > { %v309_v41 = vpop.permute.xlu1 %308  ;;  %v314_v43 = vpop.permute.xlu0 %313 }
 0x18c   : > { %v316_v45 = vadd.f32 %v309_v41, %v304_v39  ;;  %v317_v46 = vadd.f32 %v314_v43, %v305_v40 }
 0x18e   : > { %v320_v47 = vadd.f32 %v318_v42, %v316_v45  ;;  %v321_v48 = vadd.f32 %v319_v44, %v317_v46 }
 0x190   : > { %v322_v49 = vmax.f32 %v320_v47, 0.0  ;;  %v323_v50 = vmax.f32 %v321_v48, 0.0 }
 0x192   : > { %325 = vst.msk [vmem:[%s244_s23] sm:$0xff] %vm324_vm1, %v322_v49  ;;  %326 = vst.msk [vmem:[%s244_s23 + $0x8] sm:$0xff] %vm324_vm1, %v323_v50 }
 0x193 PF: > { %s15_s18 = sadd.s32 1, %s433_s18  }
 0x194   : > { %p12_p4 = scmp.ge.s32.totalorder %s15_s18, 4  }
 0x196   :  { %14 = sbr.rel (!%p12_p4) target bundleno = 1 (0x1), region = 73 }

// kernel: bottleneck_forward.6
= control target key start
LH: loop header
LB: loop body
LE: loop exit
PB: predicated region body
PF: predicated region fallthrough
CT: control target
= control target key end

     0   :  { %s553_s21 = smov 0   ;;  %s599_s0 = inlined_call_operand.vmem [shape: f32[2,4,64], index: 0, kind: input, shape index: {}]   ;;  %s600_s1 = inlined_call_operand.vmem [shape: f32[2,4,2], index: 1, kind: input, shape index: {}]   ;;  %s601_s2 = inlined_call_operand.vmem [shape: f32[4,1], index: 2, kind: input, shape index: {}]   ;;  %s602_s3 = inlined_call_operand.vmem [shape: f32[4,1], index: 3, kind: input, shape index: {}]   ;;  %s603_s4 = inlined_call_operand.vmem [shape: f32[16,4], index: 4, kind: input, shape index: {}]   ;;  %s604_s5 = inlined_call_operand.vmem [shape: f32[2,16,64], index: 5, kind: output, shape index: {0}]   ;;  %s605_s6 = inlined_call_operand.vmem [shape: f32[2,16,2], index: 6, kind: output, shape index: {1}]  }
   0x1 LB: > { %s465_s22 = sadd.s32 4294967295, %s511_s21   ;;  %p469_p0 = scmp.ge.s32.totalorder %s511_s21, 1  ;;  %s511_s21 = sphi %s553_s21, %s17_s21  }
   0x2   : > { %p214_p1 = scmp.lt.s32.totalorder %s511_s21, 3 }
   0x4   : > { %p215_p2 = pnand %p469_p0, %p214_p1 }
   0x5   : > { %v263_v0 = vld [vmem:[%s600_s1] sm:$0xf] (!%p215_p2)  ;;  %v264_v1 = vld [vmem:[%s600_s1 + $0x4] sm:$0xf] (!%p215_p2)  ;;  %vm267_vm0 = vcmask (!%p215_p2), 11264   ;;  %s513_s27 = smov (!%p215_p2), 1  }
   0x6   : > { %218 = sbr.rel (%p215_p2) target bundleno = 767 (0x2ff), region = 40  ;;  %v268_v2 = vsel (!%p215_p2), %vm267_vm0, %v263_v0, 0.0  ;;  %v269_v3 = vsel (!%p215_p2), %vm267_vm0, %v264_v1, 0.0  ;;  %v514_v10 = vmov (!%p215_p2), 0   ;;  %s515_s28 = smov (!%p215_p2), 127   ;;  %v516_v18 = vmov (!%p215_p2), 0.0  }
   0x7   : > { %v270_v4 = vadd.f32 (!%p215_p2), %v269_v3, %v268_v2  ;;  %501 = vset.pattern.permute.xlu1 (!%p215_p2), %v514_v10  ;;  %502 = vset.pattern.permute.xlu0 (!%p215_p2), %v514_v10  ;;  %v265_v12 = vld [vmem:[%s601_s2] sm:$0xf] (!%p215_p2)  ;;  %vm517_vm1 = vmmov (!%p215_p2), 0   ;;  %p248_p3 = scmp.lt.s32.totalorder (!%p215_p2), %s465_s22, 1  ;;  %vm309_vm2 = vcmask (!%p215_p2), 1041408   ;;  %v303_v26 = vld [vmem:[%s603_s4 + $0x8] sm:$0xff] (!%p215_p2) }
   0x8   : > { %v266_v15 = vld [vmem:[%s602_s3] sm:$0xf] (!%p215_p2)  ;;  %482 = vmatprep.subr.bf16.mxu0 (!%p215_p2), %v516_v18  ;;  %484 = vmatprep.mubr.msk.bf16.mxu0 (!%p215_p2), %vm517_vm1, %v516_v18  ;;  %vm305_vm3 = vcmask (!%p215_p2), 31744   ;;  %vm354_vm4 = vcmask (!%p215_p2), 523264   ;;  %vm371_vm5 = vcmask (!%p215_p2), 7168   ;;  %vm374_vm6 = vcmask (!%p215_p2), 15360  }
   0x9   : > { %v271_v5 = vmul.f32 (!%p215_p2), 0.0078125, %v270_v4  ;;  %v302_v25 = vld [vmem:[%s603_s4] sm:$0xff] (!%p215_p2) }
   0xa   : > { %v304_v29 = vpack.c.bf16 (!%p215_p2), %v303_v26, %v302_v25 }
   0xb   : > { %v272_v6 = vmul.f32 (!%p215_p2), %v271_v5, %v271_v5 }
   0xd   : > { %274 = vrot.lane.b32.xlu0 %v272_v6, %s513_s27  ;;  %s607_s22 = smov (!%p248_p3, %s465_s22), 1 }
   0xe   : > { %s470_s9 = sshll.u32 %s607_s22, 2  ;;  %s478_s17 = sshll.u32 %s607_s22, 4 }
   0xf   : > { %s251_s12 = scalar_lea.vmem %s599_s0, %s470_s9  ;;  %s256_s20 = scalar_lea.vmem %s604_s5, %s478_s17 }
  0x10   : > { %v287_v20 = vld [vmem:[%s251_s12] sm:$0xf]  ;;  %s261_s24 = scalar_lea.vmem %s605_s6, %s478_s17 }
  0x7f   : > { %v275_v7 = vpop.permute.xlu0 %274 }
  0x80   : > { %v277_v8 = vsub.f32 %v271_v5, %v275_v7 }
  0x82   : > { %v278_v9 = vadd.f32 1e-05, %v277_v8 }
  0x84   : > { %503 = vrsqrt.f32 %v278_v9 }
  0x8e   : > { %v504_v11 = vpop.eup %503 }
  0x8f   : > { %281 = vrot.lane.b32.xlu0 %v504_v11, %s515_s28 }
 0x101   : > { %v282_v13 = vpop.permute.xlu0 %281 }
 0x102   : > { %v284_v14 = vmul.f32 %v282_v13, %v265_v12 }
 0x104   : > { %v285_v16 = vmul.f32 %v284_v14, %v271_v5  ;;  %290 = vperm.xlu1 %501, %v284_v14  }
 0x106   : > { %v286_v17 = vsub.f32 %v266_v15, %v285_v16 }
 0x108   : > { %296 = vperm.xlu1 %501, %v286_v17  }
 0x183   : > { %v291_v19 = vpop.permute.xlu1 %290 }
 0x184   : > { %v293_v21 = vmul.f32 %v291_v19, %v287_v20 }
 0x187   : > { %v297_v22 = vpop.permute.xlu1 %296 }
 0x188   : > { %v299_v23 = vadd.f32 %v297_v22, %v293_v21 }
 0x18a   : > { %v300_v24 = vmax.f32 %v299_v23, 0.0 }
 0x18c   : > { %v301_v27 = vpack.c.bf16 %v300_v24, %v300_v24 }
 0x18e   : > { %v311_v28 = vsel %vm309_vm2, %v301_v27, 0 }
 0x18f   : > { %483 = vmatpush3.bf16.msra.mxu0 %v311_v28 }
 0x192   : > { %485 = vmatmul.mubr.msk.bf16.vlgmr.msra.gmra.mrb[0].mxu0 %vm305_vm3, %v304_v29 }
 0x265   : > { %v347_v30 = vpop.f32.mrb[0].mxu0 }
 0x266   : > { %355 = vst.msk [vmem:[%s256_s20] sm:$0xff] %vm354_vm4, %v347_v30  ;;  %v486_v31 = vpop.f32.mrb[1].mxu0  ;;  %v357_v32 = vsel %vm354_vm4, %v347_v30, 0.0  ;;  %v363_v33 = vmul.f32 %v347_v30, %v347_v30 }
 0x267   : > { %358 = vadd.xlane.f32.xlu0 %v357_v32  ;;  %v350_v34 = vpop.f32.mrb[2].mxu0 }
 0x268   : > { %356 = vst.msk [vmem:[%s256_s20 + $0x8] sm:$0xff] %vm354_vm4, %v350_v34  ;;  %v487_v35 = vpop.f32.mrb[3].mxu0  ;;  %v360_v36 = vsel %vm354_vm4, %v350_v34, 0.0  ;;  %v365_v37 = vsel %vm354_vm4, %v363_v33, 0.0  ;;  %v364_v38 = vmul.f32 %v350_v34, %v350_v34 }
 0x269   : > { %361 = vadd.xlane.f32.xlu1 %v360_v36 }
 0x26a   : > { %v368_v39 = vsel %vm354_vm4, %v364_v38, 0.0 }
 0x26b   : > { %366 = vadd.xlane.f32.xlu0 %v365_v37 }
 0x26f   : > { %369 = vadd.xlane.f32.xlu0 %v368_v39 }
 0x2f4   : > { %v359_v40 = vpop.xlane.xlu0 %358 }
 0x2f6   : > { %v362_v43 = vpop.xlane.xlu1 %361 }
 0x2f8   : > { %v367_v41 = vpop.xlane.xlu0 %366 }
 0x2f9   : > { %v372_v42 = vsel %vm371_vm5, %v359_v40, %v367_v41 }
 0x2fa   : > { %375 = vst.msk [vmem:[%s261_s24] sm:$0xff] %vm374_vm6, %v372_v42 }
 0x2fc   : > { %v370_v44 = vpop.xlane.xlu0 %369 }
 0x2fd   : > { %v373_v45 = vsel %vm371_vm5, %v362_v43, %v370_v44 }
 0x2fe   : > { %376 = vst.msk [vmem:[%s261_s24 + $0x8] sm:$0xff] %vm374_vm6, %v373_v45 }
 0x2ff PF: > { %s17_s21 = sadd.s32 1, %s511_s21  }
 0x300   : > { %p14_p4 = scmp.ge.s32.totalorder %s17_s21, 4  }
 0x302   :  { %16 = sbr.rel (!%p14_p4) target bundleno = 1 (0x1), region = 82 }

// kernel: bottleneck_forward.5
= control target key start
LH: loop header
LB: loop body
LE: loop exit
PB: predicated region body
PF: predicated region fallthrough
CT: control target
= control target key end

     0   :  { %s1703_s21 = smov 0   ;;  %s2131_s0 = inlined_call_operand.vmem [shape: f32[2,4,8,8], index: 0, kind: input, shape index: {}]   ;;  %s2132_s1 = inlined_call_operand.vmem [shape: f32[2,4,2], index: 1, kind: input, shape index: {}]   ;;  %s2133_s2 = inlined_call_operand.vmem [shape: f32[4,1], index: 2, kind: input, shape index: {}]   ;;  %s2134_s3 = inlined_call_operand.vmem [shape: f32[4,1], index: 3, kind: input, shape index: {}]   ;;  %s2135_s4 = inlined_call_operand.vmem [shape: f32[4,36], index: 4, kind: input, shape index: {}]   ;;  %s2136_s5 = inlined_call_operand.vmem [shape: f32[2,4,64], index: 5, kind: output, shape index: {0}]   ;;  %s2137_s6 = inlined_call_operand.vmem [shape: f32[2,4,2], index: 6, kind: output, shape index: {1}]  }
   0x1 LB: > { %s1519_s22 = sadd.s32 4294967295, %s1650_s21   ;;  %p1523_p0 = scmp.ge.s32.totalorder %s1650_s21, 1  ;;  %s1650_s21 = sphi %s1703_s21, %s17_s21  }
   0x2   : > { %p215_p1 = scmp.lt.s32.totalorder %s1650_s21, 3 }
   0x4   : > { %p216_p2 = pnand %p1523_p0, %p215_p1 }
   0x5   : > { %v262_v0 = vld [vmem:[%s2132_s1] sm:$0xf] (!%p216_p2)  ;;  %v263_v1 = vld [vmem:[%s2132_s1 + $0x4] sm:$0xf] (!%p216_p2)  ;;  %vm266_vm0 = vcmask (!%p216_p2), 11264   ;;  %s1652_s27 = smov (!%p216_p2), 1   ;;  %v294_v14 = vlaneseq (!%p216_p2) }
   0x6   : > { %219 = sbr.rel (%p216_p2) target bundleno = 1210 (0x4ba), region = 40  ;;  %v267_v2 = vsel (!%p216_p2), %vm266_vm0, %v262_v0, 0.0  ;;  %v268_v3 = vsel (!%p216_p2), %vm266_vm0, %v263_v1, 0.0  ;;  %v1653_v10 = vmov (!%p216_p2), 0   ;;  %s1654_s28 = smov (!%p216_p2), 127   ;;  %vm432_vm1 = vcmask (!%p216_p2), 7168  }
   0x7   : > { %v269_v4 = vadd.f32 (!%p216_p2), %v268_v3, %v267_v2  ;;  %1570 = vset.pattern.permute.xlu1 (!%p216_p2), %v1653_v10  ;;  %1571 = vset.pattern.permute.xlu0 (!%p216_p2), %v1653_v10  ;;  %v1655_v12 = vmov (!%p216_p2), 1966171168   ;;  %v1721_v16 = vshrl.u32 (!%p216_p2), %v294_v14, 7  ;;  %v264_v17 = vld [vmem:[%s2133_s2] sm:$0xf] (!%p216_p2)  ;;  %p248_p3 = scmp.lt.s32.totalorder (!%p216_p2), %s1519_s22, 1 }
   0x8   : > { %v292_v13 = vunpack.c.l.s4 (!%p216_p2), %v1655_v12  ;;  %v265_v21 = vld [vmem:[%s2134_s3] sm:$0xf] (!%p216_p2)  ;;  %vm437_vm2 = vcmask (!%p216_p2), 72704   ;;  %vm454_vm3 = vcmask (!%p216_p2), 1040384   ;;  %vm495_vm4 = vcmask (!%p216_p2), 1046528   ;;  %s1657_s13 = smov (!%p216_p2), 126  }
   0x9   : > { %v270_v5 = vmul.f32 (!%p216_p2), 0.0078125, %v269_v4  ;;  %v317_v24 = vsub.s32 (!%p216_p2), 0, %v1721_v16  ;;  %vm536_vm5 = vcmask (!%p216_p2), 1045504   ;;  %s1660_s14 = smov (!%p216_p2), 16   ;;  %s1661_s15 = smov (!%p216_p2), 8   ;;  %vm1667_vm6 = vmmov (!%p216_p2), 0  }
   0xa   : > { %v293_v15 = vunpack.c.0.s8 (!%p216_p2), %v292_v13  ;;  %s1662_s16 = smov (!%p216_p2), 32   ;;  %s1663_s17 = smov (!%p216_p2), 24   ;;  %vm1329_vm7 = vcmask (!%p216_p2), 64512   ;;  %vm1335_vm8 = vcmask (!%p216_p2), 130048   ;;  %vm1341_vm9 = vcmask (!%p216_p2), 195584  }
   0xb   : > { %v271_v6 = vmul.f32 (!%p216_p2), %v270_v5, %v270_v5  ;;  %s1664_s18 = smov (!%p216_p2), 40   ;;  %s1665_s19 = smov (!%p216_p2), 48   ;;  %vm1347_vm10 = vcmask (!%p216_p2), 261120   ;;  %vm1353_vm11 = vcmask (!%p216_p2), 326656   ;;  %vm1359_vm12 = vcmask (!%p216_p2), 392192  }
   0xc   : > { %v296_v18 = vsub.s32 (!%p216_p2), %v293_v15, %v1721_v16  ;;  %s1666_s20 = smov (!%p216_p2), 56   ;;  %vm1365_vm13 = vcmask (!%p216_p2), 457728   ;;  %vm1380_vm14 = vcmask (!%p216_p2), 1041408   ;;  %vm1376_vm15 = vcmask (!%p216_p2), 293888  }
   0xd   : > { %273 = vrot.lane.b32.xlu0 %v271_v6, %s1652_s27  ;;  %s2139_s22 = smov (!%p248_p3, %s1519_s22), 1 }
   0xe   : > { %s1531_s9 = sshll.u32 %s2139_s22, 5  ;;  %s1526_s25 = sshll.u32 %s2139_s22, 2 }
   0xf   : > { %s252_s12 = scalar_lea.vmem %s2131_s0, %s1531_s9  ;;  %s260_s7 = scalar_lea.vmem %s2137_s6, %s1526_s25 }
  0x10   : > { %v287_v47 = vld [vmem:[%s252_s12 + $0x8] sm:$0xff]  ;;  %v289_v51 = vld [vmem:[%s252_s12 + $0x18] sm:$0xff]  ;;  %v286_v53 = vld [vmem:[%s252_s12] sm:$0xff] }
  0x11   : > { %v288_v60 = vld [vmem:[%s252_s12 + $0x10] sm:$0xff] }
  0x7f   : > { %v274_v7 = vpop.permute.xlu0 %273 }
  0x80   : > { %v276_v8 = vsub.f32 %v270_v5, %v274_v7  ;;  %v1656_v7 = vmov 1983009808  }
  0x82   : > { %v277_v9 = vadd.f32 1e-05, %v276_v8  ;;  %v580_v8 = vunpack.c.l.s4 %v1656_v7 }
  0x84   : > { %1642 = vrsqrt.f32 %v277_v9  ;;  %v581_v15 = vunpack.c.0.s8 %v580_v8 }
  0x8e   : > { %v1643_v11 = vpop.eup %1642 }
  0x8f   : > { %280 = vrot.lane.b32.xlu0 %v1643_v11, %s1654_s28 }
 0x101   : > { %v281_v19 = vpop.permute.xlu0 %280 }
 0x102   : > { %v283_v20 = vmul.f32 %v281_v19, %v264_v17 }
 0x104   : > { %v284_v22 = vmul.f32 %v283_v20, %v270_v5  ;;  %v297_v23 = vrot.slane %v283_v20, %v296_v18 }
 0x106   : > { %v285_v25 = vsub.f32 %v265_v21, %v284_v22  ;;  %v298_v26 = vcombine.high %v297_v23, %v297_v23  ;;  %v305_v27 = vrot.slane %v297_v23, %v296_v18 }
 0x108   : > { %v358_v28 = vrot.slane %v285_v25, %v296_v18  ;;  %v318_v29 = vrot.slane %v305_v27, %v317_v24  ;;  %v313_v30 = vcombine.high %v305_v27, %v305_v27  ;;  %v312_v31 = vrot.slane %v298_v26, %v296_v18 }
 0x10a   : > { %332 = vperm.xlu1 %1570, %v318_v29   ;;  %v326_v32 = vrot.slane %v313_v30, %v317_v24  ;;  %v359_v33 = vcombine.high %v358_v28, %v358_v28  ;;  %v322_v34 = vrot.slane %v312_v31, %v317_v24  ;;  %v314_v36 = vcombine.high %v312_v31, %v312_v31 }
 0x10b   : > { %v366_v40 = vrot.slane %v358_v28, %v296_v18 }
 0x10c   : > { %340 = vperm.xlu0 %1571, %v326_v32   ;;  %v373_v35 = vrot.slane %v359_v33, %v296_v18  ;;  %v330_v39 = vrot.slane %v314_v36, %v317_v24 }
 0x10d   : > { %v379_v42 = vrot.slane %v366_v40, %v317_v24  ;;  %v374_v43 = vcombine.high %v366_v40, %v366_v40 }
 0x10e   : > { %336 = vperm.xlu1 %1570, %v322_v34   ;;  %v383_v37 = vrot.slane %v373_v35, %v317_v24  ;;  %v375_v38 = vcombine.high %v373_v35, %v373_v35 }
 0x10f   : > { %v387_v44 = vrot.slane %v374_v43, %v317_v24 }
 0x110   : > { %397 = vperm.xlu0 %1571, %v383_v37   ;;  %v391_v41 = vrot.slane %v375_v38, %v317_v24  ;;  %v1769_v38 = vsub.s32 %v581_v15, %v1721_v16 }
 0x112   : > { %344 = vperm.xlu1 %1570, %v330_v39  }
 0x114   : > { %405 = vperm.xlu0 %1571, %v391_v41  }
 0x116   : > { %393 = vperm.xlu1 %1570, %v379_v42  }
 0x11a   : > { %401 = vperm.xlu1 %1570, %v387_v44  }
 0x189   : > { %v333_v45 = vpop.permute.xlu1 %332 }
 0x18a   : > { %v347_v58 = vmul.f32 %v333_v45, %v286_v53 }
 0x18b   : > { %v341_v46 = vpop.permute.xlu0 %340 }
 0x18c   : > { %v349_v0 = vmul.f32 %v341_v46, %v288_v60 }
 0x18d   : > { %v337_v48 = vpop.permute.xlu1 %336 }
 0x18e   : > { %v348_v49 = vmul.f32 %v337_v48, %v287_v47 }
 0x18f   : > { %v398_v50 = vpop.permute.xlu0 %397 }
 0x190   : > { %v409_v52 = vadd.f32 %v398_v50, %v348_v49 }
 0x191   : > { %v345_v54 = vpop.permute.xlu1 %344 }
 0x192   : > { %v413_v55 = vmax.f32 %v409_v52, 0.0  ;;  %v350_v56 = vmul.f32 %v345_v54, %v289_v51 }
 0x193   : > { %v406_v57 = vpop.permute.xlu0 %405 }
 0x194   : > { %v411_v59 = vadd.f32 %v406_v57, %v350_v56  ;;  %422 = vrot.lane.b32.xlu0 %v413_v55, %s1652_s27 }
 0x195   : > { %v394_v61 = vpop.permute.xlu1 %393 }
 0x196   : > { %v415_v62 = vmax.f32 %v411_v59, 0.0  ;;  %v408_v63 = vadd.f32 %v394_v61, %v347_v58 }
 0x198   : > { %v412_v1 = vmax.f32 %v408_v63, 0.0  ;;  %426 = vrot.lane.b32.xlu0 %v415_v62, %s1652_s27 }
 0x199   : > { %v402_v2 = vpop.permute.xlu1 %401 }
 0x19a   : > { %v410_v3 = vadd.f32 %v402_v2, %v349_v0  ;;  %420 = vrot.lane.b32.xlu1 %v412_v1, %s1652_s27 }
 0x19c   : > { %v414_v4 = vmax.f32 %v410_v3, 0.0 }
 0x19e   : > { %424 = vrot.lane.b32.xlu1 %v414_v4, %s1652_s27 }
 0x206   : > { %v423_v5 = vpop.permute.xlu0 %422 }
 0x207   : > { %v434_v6 = vsel %vm432_vm1, 0.0, %v423_v5 }
 0x208   : > { %v439_v9 = vsel %vm437_vm2, %v434_v6, 0.0 }
 0x209   : > { %v447_v10 = vrot.slane %v439_v9, 7 }
 0x20a   : > { %v427_v11 = vpop.permute.xlu0 %426 }
 0x20b   : > { %v1748_v12 = vsel %vm454_vm3, 0.0, %v447_v10  ;;  %v460_v13 = vsel %vm454_vm3, %v447_v10, 0.0  ;;  %v436_v14 = vsel %vm432_vm1, 0.0, %v427_v11 }
 0x20c   : > { %v441_v17 = vsel %vm437_vm2, %v436_v14, 0.0  ;;  %469 = vrot.lane.b32.xlu0 %v1748_v12, %s1654_s28  ;;  %v421_v18 = vpop.permute.xlu1 %420  ;;  %v500_v21 = vrot.slane %v460_v13, 1  ;;  %v541_v22 = vrot.slane %v460_v13, 2  ;;  %v499_v24 = vrot.slane %v1748_v12, 1 }
 0x20d   : > { %v449_v19 = vrot.slane %v441_v17, 7  ;;  %v433_v20 = vsel %vm432_vm1, 0.0, %v421_v18  ;;  %v540_v28 = vrot.slane %v1748_v12, 2 }
 0x20e   : > { %v438_v23 = vsel %vm437_vm2, %v433_v20, 0.0  ;;  %v501_v41 = vsel %vm495_vm4, %v499_v24, %v500_v21 }
 0x20f   : > { %v458_v25 = vsel %vm454_vm3, 0.0, %v449_v19  ;;  %v462_v26 = vsel %vm454_vm3, %v449_v19, 0.0  ;;  %v446_v27 = vrot.slane %v438_v23, 7  ;;  %v542_v47 = vsel %vm536_vm5, %v540_v28, %v541_v22 }
 0x210   : > { %v506_v29 = vrot.slane %v462_v26, 1  ;;  %v547_v30 = vrot.slane %v462_v26, 2  ;;  %v593_v31 = vcombine.low %v1748_v12, %v458_v25  ;;  %v594_v32 = vcombine.high %v1748_v12, %v458_v25  ;;  %481 = vrot.lane.b32.xlu0 %v1748_v12, %s1657_s13  ;;  %v425_v33 = vpop.permute.xlu1 %424 }
 0x211   : > { %v455_v34 = vsel %vm454_vm3, 0.0, %v446_v27  ;;  %v459_v35 = vsel %vm454_vm3, %v446_v27, 0.0  ;;  %v435_v36 = vsel %vm432_vm1, 0.0, %v425_v33  ;;  %v505_v37 = vrot.slane %v458_v25, 1 }
 0x212   : > { %v497_v39 = vrot.slane %v459_v35, 1  ;;  %v440_v40 = vsel %vm437_vm2, %v435_v36, 0.0  ;;  %467 = vrot.lane.b32.xlu1 %v455_v34, %s1654_s28  ;;  %v496_v43 = vrot.slane %v455_v34, 1  ;;  %v546_v45 = vrot.slane %v458_v25, 2 }
 0x213   : > { %v448_v42 = vrot.slane %v440_v40, 7  ;;  %v1775_v44 = vsel %vm495_vm4, %v505_v37, %v506_v29  ;;  %v538_v46 = vrot.slane %v459_v35, 2  ;;  %v537_v52 = vrot.slane %v455_v34, 2 }
 0x214   : > { %473 = vrot.lane.b32.xlu0 %v458_v25, %s1654_s28  ;;  %v761_v48 = vcombine.low %v501_v41, %v1775_v44  ;;  %v762_v49 = vcombine.high %v501_v41, %v1775_v44  ;;  %v548_v53 = vsel %vm536_vm5, %v546_v45, %v547_v30  ;;  %v498_v58 = vsel %vm495_vm4, %v496_v43, %v497_v39 }
 0x215   : > { %v457_v50 = vsel %vm454_vm3, 0.0, %v448_v42  ;;  %v461_v51 = vsel %vm454_vm3, %v448_v42, 0.0  ;;  %v1001_v60 = vcombine.low %v542_v47, %v548_v53  ;;  %v1787_v61 = vrot.slane %v593_v31, %v1769_v38 }
 0x216   : > { %v503_v54 = vrot.slane %v461_v51, 1  ;;  %v544_v55 = vrot.slane %v461_v51, 2  ;;  %v577_v56 = vcombine.low %v455_v34, %v457_v50  ;;  %v578_v57 = vcombine.high %v455_v34, %v457_v50  ;;  %479 = vrot.lane.b32.xlu1 %v455_v34, %s1657_s13 }
 0x217   : > { %v502_v59 = vrot.slane %v457_v50, 1  ;;  %v1002_v62 = vcombine.high %v542_v47, %v548_v53  ;;  %v543_v63 = vrot.slane %v457_v50, 2  ;;  %v539_v2 = vsel %vm536_vm5, %v537_v52, %v538_v46 }
 0x218   : > { %485 = vrot.lane.b32.xlu0 %v458_v25, %s1657_s13  ;;  %v1791_v0 = vrot.slane %v577_v56, %v1769_v38  ;;  %v1794_v1 = vrot.slane %v578_v57, %v1769_v38  ;;  %v1798_v3 = vrot.slane %v761_v48, %v1769_v38  ;;  %v1801_v4 = vrot.slane %v762_v49, %v1769_v38 }
 0x219   : > { %v504_v5 = vsel %vm495_vm4, %v502_v59, %v503_v54  ;;  %v545_v8 = vsel %vm536_vm5, %v543_v63, %v544_v55  ;;  %v1807_v9 = vrot.slane %v594_v32, %v1769_v38  ;;  %v1825_v19 = vrot.slane %v1002_v62, %v1769_v38 }
 0x21a   : > { %471 = vrot.lane.b32.xlu1 %v457_v50, %s1654_s28  ;;  %v745_v6 = vcombine.low %v498_v58, %v504_v5  ;;  %v746_v7 = vcombine.high %v498_v58, %v504_v5  ;;  %v985_v10 = vcombine.low %v539_v2, %v545_v8  ;;  %v986_v11 = vcombine.high %v539_v2, %v545_v8 }
 0x21b   : > { %v642_v12 = vcombine.high %v1791_v0, %v1787_v61  ;;  %v641_v13 = vcombine.low %v1791_v0, %v1787_v61  ;;  %v657_v17 = vcombine.low %v1794_v1, %v1807_v9  ;;  %v658_v18 = vcombine.high %v1794_v1, %v1807_v9 }
 0x21c   : > { %514 = vrot.lane.b32.xlu0 %v501_v41, %s1654_s28  ;;  %v1815_v14 = vrot.slane %v745_v6, %v1769_v38  ;;  %v1818_v15 = vrot.slane %v746_v7, %v1769_v38  ;;  %v1828_v20 = vrot.slane %v985_v10, %v1769_v38  ;;  %v1831_v21 = vrot.slane %v986_v11, %v1769_v38 }
 0x21d   : > { %v1835_v22 = vrot.slane %v1001_v60, %v1769_v38  ;;  %v1658_v31 = vmov 0.0   ;;  %v1659_v34 = vmov 1934713408   ;;  %vm1424_vm2 = vcmask 519168  }
 0x21e   : > { %483 = vrot.lane.b32.xlu1 %v457_v50, %s1657_s13  ;;  %v810_v23 = vcombine.high %v1815_v14, %v1798_v3  ;;  %v809_v24 = vcombine.low %v1815_v14, %v1798_v3  ;;  %v825_v25 = vcombine.low %v1818_v15, %v1801_v4  ;;  %v826_v26 = vcombine.high %v1818_v15, %v1801_v4 }
 0x21f   : > { %v1065_v27 = vcombine.low %v1831_v21, %v1825_v19  ;;  %v1066_v28 = vcombine.high %v1831_v21, %v1825_v19  ;;  %v1049_v29 = vcombine.low %v1828_v20, %v1835_v22  ;;  %v1050_v30 = vcombine.high %v1828_v20, %v1835_v22  ;;  %1536 = vmatprep.subr.bf16.mxu0 %v1658_v31 }
 0x220   : > { %526 = vrot.lane.b32.xlu0 %v501_v41, %s1657_s13  ;;  %v644_v35 = vunpack.c.l.s4 %v1659_v34  ;;  %1542 = vmatprep.mubr.msk.bf16.mxu0 %vm1667_vm6, %v1658_v31 }
 0x222   : > { %512 = vrot.lane.b32.xlu1 %v498_v58, %s1654_s28  ;;  %v645_v39 = vunpack.c.0.s8 %v644_v35 }
 0x224   : > { %555 = vrot.lane.b32.xlu0 %v542_v47, %s1654_s28 }
 0x226   : > { %524 = vrot.lane.b32.xlu1 %v498_v58, %s1657_s13 }
 0x228   : > { %567 = vrot.lane.b32.xlu0 %v542_v47, %s1657_s13 }
 0x22a   : > { %553 = vrot.lane.b32.xlu1 %v539_v2, %s1654_s28 }
 0x22c   : > { %518 = vrot.lane.b32.xlu0 %v1775_v44, %s1654_s28 }
 0x22e   : > { %565 = vrot.lane.b32.xlu1 %v539_v2, %s1657_s13 }
 0x230   : > { %530 = vrot.lane.b32.xlu0 %v1775_v44, %s1657_s13  ;;  %v1872_v44 = vsub.s32 %v645_v39, %v1721_v16 }
 0x232   : > { %516 = vrot.lane.b32.xlu1 %v504_v5, %s1654_s28  ;;  %v656_v56 = vrot.slane %v642_v12, %v1872_v44  ;;  %v1882_v16 = vrot.slane %v641_v13, %v1872_v44  ;;  %v665_v0 = vrot.slane %v657_v17, %v1872_v44  ;;  %v672_v2 = vrot.slane %v658_v18, %v1872_v44 }
 0x233   : > { %v1913_v18 = vrot.slane %v809_v24, %v1872_v44  ;;  %v840_v3 = vrot.slane %v826_v26, %v1872_v44 }
 0x234   : > { %559 = vrot.lane.b32.xlu0 %v548_v53, %s1654_s28 }
 0x236   : > { %528 = vrot.lane.b32.xlu1 %v504_v5, %s1657_s13 }
 0x238   : > { %571 = vrot.lane.b32.xlu0 %v548_v53, %s1657_s13 }
 0x23a   : > { %557 = vrot.lane.b32.xlu1 %v545_v8, %s1654_s28  ;;  %s256_s28 = scalar_lea.vmem %s2136_s5, %s1526_s25 }
 0x23e   : > { %569 = vrot.lane.b32.xlu1 %v545_v8, %s1657_s13  ;;  %v824_v8 = vrot.slane %v810_v23, %v1872_v44  ;;  %v833_v23 = vrot.slane %v825_v25, %v1872_v44 }
 0x27e   : > { %v470_v32 = vpop.permute.xlu0 %469 }
 0x282   : > { %v482_v33 = vpop.permute.xlu0 %481 }
 0x284   : > { %v468_v36 = vpop.permute.xlu1 %467 }
 0x286   : > { %v474_v37 = vpop.permute.xlu0 %473 }
 0x287   : > { %v625_v42 = vcombine.low %v470_v32, %v474_v37  ;;  %v626_v43 = vcombine.high %v470_v32, %v474_v37 }
 0x288   : > { %v480_v40 = vpop.permute.xlu1 %479 }
 0x289   : > { %v633_v49 = vrot.slane %v625_v42, %v1769_v38  ;;  %v640_v50 = vrot.slane %v626_v43, %v1769_v38 }
 0x28a   : > { %v486_v41 = vpop.permute.xlu0 %485 }
 0x28b   : > { %v729_v53 = vcombine.low %v482_v33, %v486_v41  ;;  %v730_v54 = vcombine.high %v482_v33, %v486_v41 }
 0x28c   : > { %v472_v45 = vpop.permute.xlu1 %471 }
 0x28d   : > { %v609_v46 = vcombine.low %v468_v36, %v472_v45  ;;  %v610_v47 = vcombine.high %v468_v36, %v472_v45  ;;  %v737_v10 = vrot.slane %v729_v53, %v1769_v38  ;;  %v744_v11 = vrot.slane %v730_v54, %v1769_v38 }
 0x28e   : > { %v1874_v48 = vpop.permute.xlu0 %514 }
 0x28f   : > { %v617_v51 = vrot.slane %v609_v46, %v1769_v38  ;;  %v624_v52 = vrot.slane %v610_v47, %v1769_v38 }
 0x290   : > { %v484_v55 = vpop.permute.xlu1 %483 }
 0x291   : > { %v673_v57 = vcombine.low %v617_v51, %v633_v49  ;;  %v674_v58 = vcombine.high %v617_v51, %v633_v49  ;;  %v689_v59 = vcombine.low %v624_v52, %v640_v50  ;;  %v690_v60 = vcombine.high %v624_v52, %v640_v50 }
 0x292   : > { %v713_v61 = vcombine.low %v480_v40, %v484_v55  ;;  %v714_v62 = vcombine.high %v480_v40, %v484_v55  ;;  %v1884_v63 = vpop.permute.xlu0 %526 }
 0x293   : > { %v1895_v5 = vrot.slane %v673_v57, %v1872_v44  ;;  %v688_v6 = vrot.slane %v674_v58, %v1872_v44  ;;  %v697_v7 = vrot.slane %v689_v59, %v1872_v44  ;;  %v704_v1 = vrot.slane %v690_v60, %v1872_v44 }
 0x294   : > { %v721_v12 = vrot.slane %v713_v61, %v1769_v38  ;;  %v728_v13 = vrot.slane %v714_v62, %v1769_v38  ;;  %v1904_v17 = vpop.permute.xlu1 %512 }
 0x295   : > { %v705_v9 = vcombine.low %v1882_v16, %v1895_v5  ;;  %v707_v37 = vcombine.low %v656_v56, %v688_v6  ;;  %v706_v39 = vcombine.high %v1882_v16, %v1895_v5  ;;  %v709_v40 = vcombine.low %v665_v0, %v697_v7 }
 0x296   : > { %v777_v32 = vcombine.low %v721_v12, %v737_v10  ;;  %v778_v33 = vcombine.high %v721_v12, %v737_v10  ;;  %v793_v34 = vcombine.low %v728_v13, %v744_v11  ;;  %v794_v35 = vcombine.high %v728_v13, %v744_v11  ;;  %v1919_v36 = vpop.permute.xlu0 %555 }
 0x297   : > { %v708_v43 = vcombine.high %v656_v56, %v688_v6  ;;  %v710_v45 = vcombine.high %v665_v0, %v697_v7  ;;  %v711_v46 = vcombine.low %v672_v2, %v704_v1  ;;  %v712_v47 = vcombine.high %v672_v2, %v704_v1 }
 0x298   : > { %v1928_v14 = vrot.slane %v777_v32, %v1872_v44  ;;  %v792_v24 = vrot.slane %v778_v33, %v1872_v44  ;;  %v801_v25 = vrot.slane %v793_v34, %v1872_v44  ;;  %v808_v41 = vrot.slane %v794_v35, %v1872_v44  ;;  %v525_v42 = vpop.permute.xlu1 %524 }
 0x29a   : > { %v1933_v49 = vpop.permute.xlu0 %567  ;;  %v843_v50 = vcombine.low %v792_v24, %v824_v8  ;;  %v842_v4 = vcombine.high %v1928_v14, %v1913_v18  ;;  %v841_v15 = vcombine.low %v1928_v14, %v1913_v18  ;;  %v845_v26 = vcombine.low %v801_v25, %v833_v23 }
 0x29b   : > { %v844_v51 = vcombine.high %v792_v24, %v824_v8  ;;  %v846_v52 = vcombine.high %v801_v25, %v833_v23  ;;  %v847_v53 = vcombine.low %v808_v41, %v840_v3  ;;  %v848_v54 = vcombine.high %v808_v41, %v840_v3 }
 0x29c   : > { %v554_v55 = vpop.permute.xlu1 %553  ;;  %v1577_v57 = vpack.i.bf16 %v843_v50, %v707_v37  ;;  %v1572_v56 = vpack.i.bf16 %v842_v4, %v706_v39  ;;  %v1587_v58 = vpack.i.bf16 %v845_v26, %v709_v40 }
 0x29d   : > { %v1582_v59 = vpack.i.bf16 %v844_v51, %v708_v43  ;;  %v1592_v60 = vpack.i.bf16 %v846_v52, %v710_v45  ;;  %v1597_v61 = vpack.i.bf16 %v847_v53, %v711_v46  ;;  %v1602_v62 = vpack.i.bf16 %v848_v54, %v712_v47 }
 0x29e   : > { %1578 = vrot.lane.b32.xlu0 %v1577_v57, %s1660_s14  ;;  %1573 = vrot.lane.b32.xlu1 %v1572_v56, %s1661_s15  ;;  %v519_v0 = vpop.permute.xlu0 %518 }
 0x29f   : > { %v865_v10 = vcombine.low %v1874_v48, %v519_v0  ;;  %v866_v12 = vcombine.high %v1874_v48, %v519_v0 }
 0x2a0   : > { %v1941_v2 = vpop.permute.xlu1 %565 }
 0x2a1   : > { %v1956_v34 = vrot.slane %v865_v10, %v1769_v38  ;;  %v880_v48 = vrot.slane %v866_v12, %v1769_v38  ;;  %v1073_v10 = vrot.slane %v1065_v27, %v1872_v44  ;;  %v2013_v27 = vrot.slane %v1049_v29, %v1872_v44 }
 0x2a2   : > { %1588 = vrot.lane.b32.xlu0 %v1587_v58, %s1662_s16  ;;  %1583 = vrot.lane.b32.xlu1 %v1582_v59, %s1663_s17  ;;  %v531_v6 = vpop.permute.xlu0 %530  ;;  %v1080_v29 = vrot.slane %v1066_v28, %v1872_v44 }
 0x2a3   : > { %v897_v13 = vcombine.low %v1884_v63, %v531_v6  ;;  %v898_v23 = vcombine.high %v1884_v63, %v531_v6 }
 0x2a4   : > { %v517_v7 = vpop.permute.xlu1 %516 }
 0x2a5   : > { %v849_v8 = vcombine.low %v1904_v17, %v517_v7  ;;  %v850_v11 = vcombine.high %v1904_v17, %v517_v7  ;;  %v1964_v39 = vrot.slane %v897_v13, %v1769_v38  ;;  %v912_v3 = vrot.slane %v898_v23, %v1769_v38 }
 0x2a6   : > { %1593 = vrot.lane.b32.xlu0 %v1592_v60, %s1664_s18  ;;  %v560_v1 = vpop.permute.xlu0 %559 }
 0x2a7   : > { %v1953_v32 = vrot.slane %v849_v8, %v1769_v38  ;;  %v1959_v35 = vrot.slane %v850_v11, %v1769_v38  ;;  %v1033_v63 = vcombine.low %v1919_v36, %v560_v1  ;;  %v1034_v40 = vcombine.high %v1919_v36, %v560_v1 }
 0x2a8   : > { %v529_v33 = vpop.permute.xlu1 %528 }
 0x2a9   : > { %v881_v17 = vcombine.low %v525_v42, %v529_v33  ;;  %v882_v37 = vcombine.high %v525_v42, %v529_v33  ;;  %v913_v24 = vcombine.low %v1953_v32, %v1956_v34  ;;  %v929_v47 = vcombine.low %v1959_v35, %v880_v48 }
 0x2aa   : > { %1598 = vrot.lane.b32.xlu0 %v1597_v61, %s1665_s19  ;;  %v572_v43 = vpop.permute.xlu0 %571  ;;  %v1041_v4 = vrot.slane %v1033_v63, %v1769_v38  ;;  %v1048_v26 = vrot.slane %v1034_v40, %v1769_v38 }
 0x2ab   : > { %v1972_v25 = vrot.slane %v881_v17, %v1769_v38  ;;  %v896_v41 = vrot.slane %v882_v37, %v1769_v38  ;;  %v1984_v53 = vrot.slane %v913_v24, %v1872_v44  ;;  %v1138_v61 = vcombine.high %v1933_v49, %v572_v43 }
 0x2ac   : > { %v558_v42 = vpop.permute.xlu1 %557  ;;  %v937_v6 = vrot.slane %v929_v47, %v1872_v44  ;;  %v930_v37 = vcombine.high %v1959_v35, %v880_v48 }
 0x2ad   : > { %v1017_v45 = vcombine.low %v554_v55, %v558_v42  ;;  %v1018_v46 = vcombine.high %v554_v55, %v558_v42  ;;  %v945_v50 = vcombine.low %v1972_v25, %v1964_v39  ;;  %v961_v36 = vcombine.low %v896_v41, %v912_v3 }
 0x2ae   : > { %1603 = vrot.lane.b32.xlu0 %v1602_v62, %s1666_s20  ;;  %v1137_v55 = vcombine.low %v1933_v49, %v572_v43  ;;  %v1152_v33 = vrot.slane %v1138_v61, %v1769_v38  ;;  %v946_v35 = vcombine.high %v1972_v25, %v1964_v39  ;;  %v944_v48 = vrot.slane %v930_v37, %v1872_v44 }
 0x2af   : > { %v1025_v51 = vrot.slane %v1017_v45, %v1769_v38  ;;  %v1032_v52 = vrot.slane %v1018_v46, %v1769_v38  ;;  %v1987_v54 = vrot.slane %v945_v50, %v1872_v44  ;;  %v969_v56 = vrot.slane %v961_v36, %v1872_v44 }
 0x2b0   : > { %v570_v57 = vpop.permute.xlu1 %569  ;;  %v1145_v11 = vrot.slane %v1137_v55, %v1769_v38  ;;  %v914_v50 = vcombine.high %v1953_v32, %v1956_v34  ;;  %v960_v28 = vrot.slane %v946_v35, %v1872_v44  ;;  %v1064_v32 = vrot.slane %v1050_v30, %v1872_v44 }
 0x2b1   : > { %v1081_v58 = vcombine.low %v1025_v51, %v1041_v4  ;;  %v1097_v59 = vcombine.low %v1032_v52, %v1048_v26  ;;  %v977_v60 = vcombine.low %v1984_v53, %v1987_v54  ;;  %v1121_v62 = vcombine.low %v1941_v2, %v570_v57 }
 0x2b2   : > { %v1122_v0 = vcombine.high %v1941_v2, %v570_v57  ;;  %v1098_v7 = vcombine.high %v1032_v52, %v1048_v26  ;;  %v962_v2 = vcombine.high %v896_v41, %v912_v3  ;;  %v981_v1 = vcombine.low %v937_v6, %v969_v56 }
 0x2b3   : > { %v1105_v8 = vrot.slane %v1097_v59, %v1872_v44  ;;  %v2004_v12 = vrot.slane %v1081_v58, %v1872_v44  ;;  %v1129_v49 = vrot.slane %v1121_v62, %v1769_v38  ;;  %v1082_v42 = vcombine.high %v1025_v51, %v1041_v4 }
 0x2b4   : > { %v1136_v13 = vrot.slane %v1122_v0, %v1769_v38  ;;  %v1112_v63 = vrot.slane %v1098_v7, %v1872_v44  ;;  %v976_v41 = vrot.slane %v962_v2, %v1872_v44  ;;  %v982_v45 = vcombine.high %v937_v6, %v969_v56 }
 0x2b5   : > { %v1117_v23 = vcombine.low %v1073_v10, %v1105_v8  ;;  %v1154_v17 = vcombine.high %v1129_v49, %v1145_v11  ;;  %v1118_v24 = vcombine.high %v1073_v10, %v1105_v8  ;;  %v1113_v38 = vcombine.low %v2013_v27, %v2004_v12 }
 0x2b6   : > { %v1169_v43 = vcombine.low %v1136_v13, %v1152_v33  ;;  %v1119_v47 = vcombine.low %v1080_v29, %v1112_v63  ;;  %v1096_v36 = vrot.slane %v1082_v42, %v1872_v44  ;;  %v1114_v19 = vcombine.high %v2013_v27, %v2004_v12 }
 0x2b7   : > { %v1622_v40 = vpack.i.bf16 %v1117_v23, %v981_v1  ;;  %v1168_v3 = vrot.slane %v1154_v17, %v1872_v44  ;;  %v1627_v46 = vpack.i.bf16 %v1118_v24, %v982_v45  ;;  %v983_v21 = vcombine.low %v944_v48, %v976_v41 }
 0x2b8   : > { %v1177_v4 = vrot.slane %v1169_v43, %v1872_v44  ;;  %v978_v39 = vcombine.high %v1984_v53, %v1987_v54  ;;  %v1120_v25 = vcombine.high %v1080_v29, %v1112_v63  ;;  %v928_v26 = vrot.slane %v914_v50, %v1872_v44 }
 0x2b9   : > { %1623 = vrot.lane.b32.xlu0 %v1622_v40, %s1662_s16  ;;  %1222 = vrot.lane.b32.xlu1 %v1168_v3, %s1660_s14  ;;  %v1632_v34 = vpack.i.bf16 %v1119_v47, %v983_v21  ;;  %v1115_v52 = vcombine.low %v1064_v32, %v1096_v36  ;;  %v984_v55 = vcombine.high %v944_v48, %v976_v41 }
 0x2ba   : > { %v1607_v51 = vpack.i.bf16 %v1114_v19, %v978_v39  ;;  %v979_v57 = vcombine.low %v928_v26, %v960_v28  ;;  %v1170_v56 = vcombine.high %v1136_v13, %v1152_v33  ;;  %v1153_v59 = vcombine.low %v1129_v49, %v1145_v11 }
 0x2bb   : > { %v1637_v58 = vpack.i.bf16 %v1120_v25, %v984_v55  ;;  %v1116_v62 = vcombine.high %v1064_v32, %v1096_v36  ;;  %v980_v20 = vcombine.high %v928_v26, %v960_v28  ;;  %v1186_v7 = vcombine.high %v1168_v3, %v1658_v31 }
 0x2bc   : > { %v1612_v61 = vpack.i.bf16 %v1115_v52, %v979_v57  ;;  %v1184_v22 = vrot.slane %v1170_v56, %v1872_v44  ;;  %v2052_v0 = vrot.slane %v1153_v59, %v1872_v44  ;;  %v1187_v8 = vcombine.high %v1177_v4, %v1658_v31 }
 0x2bd   : > { %1628 = vrot.lane.b32.xlu0 %v1627_v46, %s1664_s18  ;;  %1262 = vrot.lane.b32.xlu1 %v1177_v4, %s1662_s16  ;;  %v1617_v30 = vpack.i.bf16 %v1116_v62, %v980_v20 }
 0x2be   : > { %v1185_v6 = vcombine.high %v2052_v0, %v1658_v31  ;;  %v1188_v44 = vcombine.high %v1184_v22, %v1658_v31 }
 0x2c1   : > { %1633 = vrot.lane.b32.xlu0 %v1632_v34, %s1665_s19  ;;  %1608 = vrot.lane.b32.xlu1 %v1607_v51, %s1661_s15 }
 0x2c5   : > { %1638 = vrot.lane.b32.xlu0 %v1637_v58, %s1666_s20  ;;  %1613 = vrot.lane.b32.xlu1 %v1612_v61, %s1660_s14 }
 0x2c9   : > { %1302 = vrot.lane.b32.xlu0 %v1184_v22, %s1665_s19  ;;  %1618 = vrot.lane.b32.xlu1 %v1617_v30, %s1663_s17 }
 0x2cd   : > { %1202 = vrot.lane.b32.xlu1 %v1185_v6, %s1661_s15 }
 0x2d1   : > { %1242 = vrot.lane.b32.xlu1 %v1186_v7, %s1663_s17 }
 0x2d5   : > { %1282 = vrot.lane.b32.xlu1 %v1187_v8, %s1664_s18 }
 0x2d9   : > { %1322 = vrot.lane.b32.xlu1 %v1188_v44, %s1666_s20 }
 0x310   : > { %v1579_v10 = vpop.permute.xlu0 %1578  ;;  %v1574_v11 = vpop.permute.xlu1 %1573 }
 0x311   : > { %v1576_v13 = vunpack.i.h.bf16 %v1574_v11  ;;  %v1575_v2 = vunpack.i.l.bf16 %v1574_v11  ;;  %v1581_v23 = vunpack.i.h.bf16 %v1579_v10  ;;  %v1580_v33 = vunpack.i.l.bf16 %v1579_v10 }
 0x313   : > { %v1331_v37 = vsel %vm1329_vm7, %v841_v15, %v1576_v13  ;;  %v1330_v63 = vsel %vm1329_vm7, %v705_v9, %v1575_v2 }
 0x314   : > { %v1589_v49 = vpop.permute.xlu0 %1588  ;;  %v1584_v1 = vpop.permute.xlu1 %1583  ;;  %v1336_v3 = vsel %vm1335_vm8, %v1330_v63, %v1580_v33  ;;  %v1337_v41 = vsel %vm1335_vm8, %v1331_v37, %v1581_v23 }
 0x315   : > { %v1586_v40 = vunpack.i.h.bf16 %v1584_v1  ;;  %v1585_v24 = vunpack.i.l.bf16 %v1584_v1  ;;  %v1591_v42 = vunpack.i.h.bf16 %v1589_v49  ;;  %v1590_v43 = vunpack.i.l.bf16 %v1589_v49 }
 0x317   : > { %v1342_v18 = vsel %vm1341_vm9, %v1336_v3, %v1585_v24  ;;  %v1343_v14 = vsel %vm1341_vm9, %v1337_v41, %v1586_v40 }
 0x318   : > { %v1594_v17 = vpop.permute.xlu0 %1593  ;;  %v1348_v9 = vsel %vm1347_vm10, %v1342_v18, %v1590_v43  ;;  %v1349_v35 = vsel %vm1347_vm10, %v1343_v14, %v1591_v42 }
 0x319   : > { %v1596_v15 = vunpack.i.h.bf16 %v1594_v17  ;;  %v1595_v29 = vunpack.i.l.bf16 %v1594_v17 }
 0x31b   : > { %v1354_v46 = vsel %vm1353_vm11, %v1348_v9, %v1595_v29  ;;  %v1355_v47 = vsel %vm1353_vm11, %v1349_v35, %v1596_v15 }
 0x31c   : > { %v1599_v45 = vpop.permute.xlu0 %1598 }
 0x31d   : > { %v1601_v16 = vunpack.i.h.bf16 %v1599_v45  ;;  %v1600_v5 = vunpack.i.l.bf16 %v1599_v45 }
 0x31f   : > { %v1360_v4 = vsel %vm1359_vm12, %v1354_v46, %v1600_v5  ;;  %v1361_v19 = vsel %vm1359_vm12, %v1355_v47, %v1601_v16  ;;  %v1371_v5 = vld [vmem:[%s2135_s4] sm:$0xf] }
 0x320   : > { %v1604_v48 = vpop.permute.xlu0 %1603 }
 0x321   : > { %v1606_v50 = vunpack.i.h.bf16 %v1604_v48  ;;  %v1605_v36 = vunpack.i.l.bf16 %v1604_v48 }
 0x323   : > { %v1366_v21 = vsel %vm1365_vm13, %v1360_v4, %v1605_v36  ;;  %v1367_v28 = vsel %vm1365_vm13, %v1361_v19, %v1606_v50 }
 0x324   : > { %v1373_v39 = vpack.c.bf16 %v1367_v28, %v1366_v21 }
 0x326   : > { %1537 = vmatpush3.bf16.msra.mxu0 %v1373_v39 }
 0x327   : > { %1538 = vmatprep.subr.bf16.mxu0 %v1658_v31 }
 0x32b   : > { %v1624_v32 = vpop.permute.xlu0 %1623  ;;  %v1223_v34 = vpop.permute.xlu1 %1222 }
 0x32c   : > { %v1626_v61 = vunpack.i.h.bf16 %v1624_v32  ;;  %v1625_v8 = vunpack.i.l.bf16 %v1624_v32 }
 0x32f   : > { %v1263_v25 = vpop.permute.xlu1 %1262  ;;  %v1629_v26 = vpop.permute.xlu0 %1628 }
 0x330   : > { %v1631_v44 = vunpack.i.h.bf16 %v1629_v26  ;;  %v1630_v49 = vunpack.i.l.bf16 %v1629_v26 }
 0x333   : > { %v1609_v51 = vpop.permute.xlu1 %1608  ;;  %v1634_v52 = vpop.permute.xlu0 %1633 }
 0x334   : > { %v1611_v57 = vunpack.i.h.bf16 %v1609_v51  ;;  %v1610_v56 = vunpack.i.l.bf16 %v1609_v51  ;;  %v1636_v13 = vunpack.i.h.bf16 %v1634_v52 }
 0x336   : > { %v1333_v20 = vsel %vm1329_vm7, %v1113_v38, %v1611_v57  ;;  %v1332_v22 = vsel %vm1329_vm7, %v977_v60, %v1610_v56  ;;  %v1635_v38 = vunpack.i.l.bf16 %v1634_v52 }
 0x337   : > { %v1614_v55 = vpop.permute.xlu1 %1613  ;;  %v1639_v30 = vpop.permute.xlu0 %1638 }
 0x338   : > { %v1616_v58 = vunpack.i.h.bf16 %v1614_v55  ;;  %v1615_v59 = vunpack.i.l.bf16 %v1614_v55  ;;  %v1641_v2 = vunpack.i.h.bf16 %v1639_v30  ;;  %v1640_v1 = vunpack.i.l.bf16 %v1639_v30 }
 0x33a   : > { %v1338_v10 = vsel %vm1335_vm8, %v1332_v22, %v1615_v59  ;;  %v1339_v11 = vsel %vm1335_vm8, %v1333_v20, %v1616_v58 }
 0x33b   : > { %v1619_v62 = vpop.permute.xlu1 %1618  ;;  %v1303_v14 = vpop.permute.xlu0 %1302 }
 0x33c   : > { %v1621_v6 = vunpack.i.h.bf16 %v1619_v62  ;;  %v1620_v7 = vunpack.i.l.bf16 %v1619_v62 }
 0x33e   : > { %v1344_v12 = vsel %vm1341_vm9, %v1338_v10, %v1620_v7  ;;  %v1345_v27 = vsel %vm1341_vm9, %v1339_v11, %v1621_v6 }
 0x33f   : > { %v1350_v53 = vsel %vm1347_vm10, %v1344_v12, %v1625_v8  ;;  %v1351_v54 = vsel %vm1347_vm10, %v1345_v27, %v1626_v61  ;;  %v1203_v60 = vpop.permute.xlu1 %1202 }
 0x340   : > { %v1334_v23 = vsel %vm1329_vm7, %v2052_v0, %v1203_v60  ;;  %v1356_v33 = vsel %vm1353_vm11, %v1350_v53, %v1630_v49  ;;  %v1357_v17 = vsel %vm1353_vm11, %v1351_v54, %v1631_v44 }
 0x341   : > { %v1362_v37 = vsel %vm1359_vm12, %v1356_v33, %v1635_v38  ;;  %v1363_v63 = vsel %vm1359_vm12, %v1357_v17, %v1636_v13  ;;  %v1340_v42 = vsel %vm1335_vm8, %v1334_v23, %v1223_v34 }
 0x342   : > { %v1368_v40 = vsel %vm1365_vm13, %v1362_v37, %v1640_v1  ;;  %v1369_v24 = vsel %vm1365_vm13, %v1363_v63, %v1641_v2 }
 0x343   : > { %v1243_v43 = vpop.permute.xlu1 %1242  ;;  %v1374_v3 = vpack.c.bf16 %v1369_v24, %v1368_v40 }
 0x344   : > { %v1346_v41 = vsel %vm1341_vm9, %v1340_v42, %v1243_v43 }
 0x345   : > { %1539 = vmatpush3.bf16.msra.mxu0 %v1374_v3  ;;  %v1352_v0 = vsel %vm1347_vm10, %v1346_v41, %v1263_v25 }
 0x346   : > { %1540 = vmatprep.subr.bf16.mxu0 %v1658_v31  ;;  %v1372_v31 = vpack.c.bf16 %v1371_v5, %v1371_v5 }
 0x347   : > { %v1283_v45 = vpop.permute.xlu1 %1282 }
 0x348   : > { %v1358_v18 = vsel %vm1353_vm11, %v1352_v0, %v1283_v45 }
 0x349   : > { %v1364_v15 = vsel %vm1359_vm12, %v1358_v18, %v1303_v14 }
 0x34b   : > { %v1323_v29 = vpop.permute.xlu1 %1322 }
 0x34c   : > { %v1370_v16 = vsel %vm1365_vm13, %v1364_v15, %v1323_v29 }
 0x34d   : > { %v1375_v9 = vpack.c.bf16 %v1370_v16, %v1370_v16 }
 0x34f   : > { %v1382_v35 = vsel %vm1380_vm14, %v1375_v9, 0 }
 0x350   : > { %1541 = vmatpush3.bf16.msra.mxu0 %v1382_v35 }
 0x353   : > { %1543 = vmatmul.mubr.msk.bf16.vlgmr.msra.gmra.mrb[0].mxu0 %vm1376_vm15, %v1372_v31 }
 0x426   : > { %v1418_v48 = vpop.f32.mrb[0].mxu0 }
 0x427   : > { %v1544_v46 = vpop.f32.mrb[1].mxu0  ;;  %v1426_v47 = vsel %vm1424_vm2, %v1418_v48, 0.0  ;;  %1425 = vst.msk [vmem:[%s256_s28] sm:$0xf] %vm1424_vm2, %v1418_v48  ;;  %v1429_v50 = vmul.f32 %v1418_v48, %v1418_v48 }
 0x428   : > { %1427 = vadd.xlane.f32.xlu0 %v1426_v47  ;;  %v1421_v36 = vpop.f32.mrb[2].mxu0 }
 0x429   : > { %v1545_v4 = vpop.f32.mrb[3].mxu0  ;;  %v1430_v19 = vsel %vm1424_vm2, %v1429_v50, 0.0 }
 0x42a   : > { %1431 = vadd.xlane.f32.xlu1 %v1430_v19 }
 0x4b5   : > { %v1428_v21 = vpop.xlane.xlu0 %1427 }
 0x4b7   : > { %v1432_v28 = vpop.xlane.xlu1 %1431 }
 0x4b8   : > { %v1433_v39 = vsel %vm432_vm1, %v1428_v21, %v1432_v28 }
 0x4b9   : > { %1434 = vst.msk [vmem:[%s260_s7] sm:$0xf] %vm266_vm0, %v1433_v39 }
 0x4ba PF: > { %s17_s21 = sadd.s32 1, %s1650_s21  }
 0x4bb   : > { %p14_p4 = scmp.ge.s32.totalorder %s17_s21, 4  }
 0x4bd   :  { %16 = sbr.rel (!%p14_p4) target bundleno = 1 (0x1), region = 82 }

</bundles_post_ra>
